<compile_context>
chip_gen: v5e
topology: v5e:2x2
jax: 0.10.0
libtpu: 0.0.40
codegen_flags: <defaults>
</compile_context>

<pallas_src>
import functools

import jax
import jax.numpy as jnp
from jax.experimental import pallas as pl
from jax.experimental.pallas import tpu as pltpu


# --------------------------------------------------------------------------
# Kernel: one (o_tile, tm) output block per grid step.
#   out[o, m] = sum_k ( relu(clip(p[k,m]-l[k,o])) *
#                       relu(clip(r[k,o]-p[k,m])) * n[k,o] )^2
# --------------------------------------------------------------------------
def _local_conv2d_kernel(p_ref, l_ref, r_ref, n_ref, o_ref, *,
                         num_real, o_tile, x_min, x_max, fuse_clip):
    p = p_ref[...]                      # (K_pad, tm), compute dtype (f32 or bf16)
    l = l_ref[0]                        # (K_pad, o_tile)  -- hoisted bound loads
    r = r_ref[0]
    n = n_ref[0]
    tm = p.shape[1]
    for o in range(num_real):           # small static unroll (<= 16 channels)
        lo = l[:, o:o + 1]              # (K_pad, 1), lane-broadcast against p
        ro = r[:, o:o + 1]
        no = n[:, o:o + 1]
        if fuse_clip:
            # relu(hardtanh(t, x_min, x_max)) == min(max(t, 0), x_max)
            # (valid because x_min <= 0 <= x_max)
            a = jnp.minimum(jnp.maximum(p - lo, 0.0), x_max)
            b = jnp.minimum(jnp.maximum(ro - p, 0.0), x_max)
        else:
            a = jnp.maximum(jnp.clip(p - lo, x_min, x_max), 0.0)
            b = jnp.maximum(jnp.clip(ro - p, x_min, x_max), 0.0)
        v = a * b * no
        sq = (v * v).astype(jnp.float32)                      # accumulate in f32
        # direct per-channel store (lane-dense, tm % 128 == 0); no concat/spills
        o_ref[o:o + 1, :] = jnp.sum(sq, axis=0, keepdims=True)
    if num_real < o_tile:               # padded channel rows: zero once, never computed
        o_ref[num_real:, :] = jnp.zeros((o_tile - num_real, tm), jnp.float32)


# --------------------------------------------------------------------------
# Trace-time hardware queries (safe fallbacks if unavailable).
# --------------------------------------------------------------------------
def _default_compute_dtype():
    """bf16 VALU exists on v6e / v7x; v5e and older lack it -> use f32 there."""
    try:
        kind = jax.devices()[0].device_kind.lower()
    except Exception:
        return jnp.float32
    if ("v6" in kind) or ("v7" in kind) or ("7x" in kind):
        return jnp.bfloat16
    return jnp.float32


def _vmem_capacity_bytes():
    try:
        cap = int(pltpu.get_tpu_info().vmem_capacity_bytes)
        if cap > 0:
            return cap
    except Exception:
        pass
    return 64 * 1024 * 1024             # conservative default (v7x per-TC VMEM)


def _choose_tile_cols(n_cols, cap_cols, k_pad, o_total, compute_bytes):
    """Lane-tile width in 128-lane columns, via a tiny per-step cost model."""
    # ~10 VALU ops/element; VPU ~4096 f32 lanes/cycle, ~2x for packed bf16.
    ops_per_cycle = 4096 * (2 if compute_bytes == 2 else 1)
    col_cycles = (128 * k_pad * o_total * 10) // ops_per_cycle + 1
    step_overhead = 600                 # ~0.35 us fixed pipeline cost per grid step
    num_tc = 2                          # v7x megacore; harmless on 1-TC chips
    best_tc, best_key = 1, None
    for tc in range(1, max(1, cap_cols) + 1):
        steps = -(-n_cols // tc)
        per_core = -(-steps // num_tc)
        cost = per_core * (tc * col_cycles + step_overhead)
        key = (cost, -tc)
        if best_key is None or key < best_key:
            best_key, best_tc = key, tc
    return best_tc


# --------------------------------------------------------------------------
# Wrapper
# --------------------------------------------------------------------------
def local_conv2d_forward(x, left_bounds, right_bounds, *, size, stride,
                         x_min=-1.0, x_max=1.0, tile_m=1024, compute_dtype=None):
    """x: (B, C_in, H, W); bounds: (O, C_in, size, size). Returns (B, O, Ho, Wo)."""
    if compute_dtype is None:
        compute_dtype = _default_compute_dtype()
    compute_dtype = jnp.dtype(compute_dtype)
    cbytes = compute_dtype.itemsize

    B, C, H, W = x.shape
    O = left_bounds.shape[0]
    Ho = (H - size) // stride + 1
    Wo = (W - size) // stride + 1
    K = C * size * size
    M = B * Ho * Wo

    # sublane-aligned reduction axis (16 for packed bf16, 8 for f32)
    k_align = 16 if cbytes == 2 else 8
    K_pad = -(-K // k_align) * k_align

    # out-channel tiling: <= 16 channels keeps the unrolled loop small; bigger O
    # gets an o-grid axis of 8-channel blocks.
    O_pad = -(-O // 8) * 8
    if O_pad <= 16:
        o_tile, o_tiles = O_pad, 1
        num_real = O                    # padded rows are zero-filled, not computed
    else:
        o_tile, o_tiles = 8, O_pad // 8
        num_real = o_tile               # TODO(synk): last o-tile still computes up to 7
                                        # dead (norm=0) channels when O % 8 != 0
    O_tot = o_tile * o_tiles

    # ---- im2col via static strided slices (no gather) -----------------------
    xc = x.astype(compute_dtype)
    cols = []
    for u in range(size):
        for v in range(size):
            cols.append(xc[:, :,
                           u:u + stride * (Ho - 1) + 1:stride,
                           v:v + stride * (Wo - 1) + 1:stride])       # (B, C, Ho, Wo)
    patches = jnp.stack(cols, axis=2)                                 # (B, C, s*s, Ho, Wo)
    # K flattened over (c, u, v); M flattened over (b, i, j) -> matches torch unfold order
    patches_t = jnp.transpose(patches, (1, 2, 0, 3, 4)).reshape(K, M)

    # ---- lane-tile sizing ----------------------------------------------------
    vmem_cap = _vmem_capacity_bytes()
    vmem_budget = max(16 << 20, int(0.6 * vmem_cap))
    n_cols = -(-M // 128)
    per_col_bytes = 128 * (2 * K_pad * cbytes + 2 * o_tile * 4)       # dbl-buffered in/out
    bounds_bytes = 2 * 3 * K_pad * o_tile * cbytes
    avail = max(vmem_budget - bounds_bytes - (1 << 20), per_col_bytes)
    cap_cols = min(max(1, tile_m // 128), max(1, avail // per_col_bytes), n_cols)
    tc = _choose_tile_cols(n_cols, cap_cols, K_pad, O_tot, cbytes)
    tm = tc * 128
    m_tiles = -(-M // tm)
    M_pad = m_tiles * tm

    # pad (fused by XLA with the producing transpose/reshape)
    patches_t = jnp.pad(patches_t, ((0, K_pad - K), (0, M_pad - M)))

    # ---- per-output-channel params, blocked as (o_tiles, K_pad, o_tile) ------
    left_t = left_bounds.reshape(O, K).T.astype(jnp.float32)          # (K, O)
    right_t = right_bounds.reshape(O, K).T.astype(jnp.float32)
    # Precondition (same as the PyTorch layer): right_bounds != left_bounds.
    norm_t = 4.0 / (right_t - left_t) ** 2
    pad_k, pad_o = K_pad - K, O_tot - O
    left_t = jnp.pad(left_t, ((0, pad_k), (0, pad_o)))
    right_t = jnp.pad(right_t, ((0, pad_k), (0, pad_o)), constant_values=1.0)
    norm_t = jnp.pad(norm_t, ((0, pad_k), (0, pad_o)))                # zero norm -> 0 output

    def _to_blocks(a):                  # (K_pad, O_tot) -> (o_tiles, K_pad, o_tile)
        return jnp.transpose(a.reshape(K_pad, o_tiles, o_tile),
                             (1, 0, 2)).astype(compute_dtype)

    left_b, right_b, norm_b = _to_blocks(left_t), _to_blocks(right_t), _to_blocks(norm_t)

    fuse_clip = (float(x_min) <= 0.0 <= float(x_max))
    kernel = functools.partial(_local_conv2d_kernel,
                               num_real=num_real, o_tile=o_tile,
                               x_min=float(x_min), x_max=float(x_max),
                               fuse_clip=fuse_clip)

    cost = pl.CostEstimate(
        flops=int(10 * K_pad * M_pad * O_tot),
        transcendentals=0,
        bytes_accessed=int(cbytes * K_pad * M_pad + 4 * O_tot * M_pad
                           + cbytes * 3 * K_pad * o_tile * m_tiles * o_tiles),
    )

    out = pl.pallas_call(
        kernel,
        out_shape=jax.ShapeDtypeStruct((O_tot, M_pad), jnp.float32),
        grid_spec=pltpu.PrefetchScalarGridSpec(
            num_scalar_prefetch=0,
            grid=(m_tiles, o_tiles),                                  # m outer, o inner
            in_specs=[
                pl.BlockSpec((K_pad, tm), lambda i, j: (0, i)),       # patches (fetched once per m-tile)
                pl.BlockSpec((1, K_pad, o_tile), lambda i, j: (j, 0, 0)),   # left
                pl.BlockSpec((1, K_pad, o_tile), lambda i, j: (j, 0, 0)),   # right
                pl.BlockSpec((1, K_pad, o_tile), lambda i, j: (j, 0, 0)),   # norm
            ],
            out_specs=pl.BlockSpec((o_tile, tm), lambda i, j: (j, i)),
        ),
        compiler_params=pltpu.CompilerParams(
            dimension_semantics=("parallel", "parallel"),
            vmem_limit_bytes=max(32 << 20, min(int(0.7 * vmem_cap), 100 << 20)),
        ),
        cost_estimate=cost,
    )(patches_t, left_b, right_b, norm_b)

    out = out[:O, :M].reshape(O, B, Ho, Wo)
    # NOTE: the PyTorch module reshapes Ho*Wo back with h = int(sqrt(Ho*Wo));
    # for square spatial outputs (the intended use) this equals (B, O, Ho, Wo).
    return jnp.transpose(out, (1, 0, 2, 3))


# --------------------------------------------------------------------------
# Pure-JAX reference (mirrors the PyTorch forward exactly) for verification.
# --------------------------------------------------------------------------
def reference_forward(x, left_bounds, right_bounds, *, size, stride,
                      x_min=-1.0, x_max=1.0):
    B, C, H, W = x.shape
    Ho = (H - size) // stride + 1
    Wo = (W - size) // stride + 1
    ii = (jnp.arange(Ho) * stride)[:, None] + jnp.arange(size)[None, :]
    jj = (jnp.arange(Wo) * stride)[:, None] + jnp.arange(size)[None, :]
    patches = x[:, :, ii[:, None, :, None], jj[None, :, None, :]]  # (B,C,Ho,Wo,s,s)
    p = patches[:, None]                                           # (B,1,C,Ho,Wo,s,s)
    lb = left_bounds[None, :, :, None, None, :, :]                 # (1,O,C,1,1,s,s)
    rb = right_bounds[None, :, :, None, None, :, :]
    nc = 4.0 / (rb - lb) ** 2
    a = jnp.maximum(jnp.clip(p - lb, x_min, x_max), 0.0)
    b = jnp.maximum(jnp.clip(rb - p, x_min, x_max), 0.0)
    res = (a * b * nc) ** 2
    return res.sum(axis=(2, 5, 6))  # (B, O, Ho, Wo)


def make_params(in_channels, out_channels, size, x_min=-1.0, x_max=1.0):
    """Deterministic init matching LocalConv2DLayer.reset_parameters()."""
    domain = jnp.linspace(x_min, x_max, out_channels + 1, dtype=jnp.float32)
    left = jnp.broadcast_to(domain[:-1].reshape(-1, 1, 1, 1),
                            (out_channels, in_channels, size, size))
    right = jnp.broadcast_to(domain[1:].reshape(-1, 1, 1, 1),
                             (out_channels, in_channels, size, size))
    return left, right


if __name__ == "__main__":
    B, C_in, O, H, W = 2, 4, 8, 16, 16
    size, stride = 3, 1
    x_min, x_max = -1.0, 1.0

    key = jax.random.PRNGKey(0)
    x = jax.random.uniform(key, (B, C_in, H, W), dtype=jnp.float32,
                           minval=x_min, maxval=x_max)
    left, right = make_params(C_in, O, size, x_min, x_max)

    ref = reference_forward(x, left, right, size=size, stride=stride,
                            x_min=x_min, x_max=x_max)
    ref = jax.block_until_ready(ref)

    # Correctness-gating run in f32 (bit-for-bit comparable with the reference).
    out = local_conv2d_forward(x, left, right, size=size, stride=stride,
                               x_min=x_min, x_max=x_max,
                               compute_dtype=jnp.float32)
    out = jax.block_until_ready(out)
    assert out.shape == (B, O, (H - size) // stride + 1, (W - size) // stride + 1)
    assert jnp.allclose(out, ref, rtol=1e-5, atol=1e-5), \
        f"max abs err = {jnp.max(jnp.abs(out - ref))}"

    # Exercise the auto path (bf16 compute on v6e/v7x, f32 on older chips).
    out_auto = local_conv2d_forward(x, left, right, size=size, stride=stride,
                                    x_min=x_min, x_max=x_max)
    out_auto = jax.block_until_ready(out_auto)
    assert out_auto.shape == out.shape
    assert bool(jnp.all(jnp.isfinite(out_auto)))
    assert float(jnp.max(jnp.abs(out_auto - ref))) < 1.0   # loose: bf16 quantization

    print("KERNEL_OK")
</pallas_src>

<mosaic_0001>
module attributes {stable_mosaic.version = 11 : i64} {
  func.func @_local_conv2d_kernel(%arg0: i32, %arg1: i32, %arg2: memref<40x256xf32, #tpu.memory_space<vmem>>, %arg3: memref<1x40x8xf32, #tpu.memory_space<vmem>>, %arg4: memref<1x40x8xf32, #tpu.memory_space<vmem>>, %arg5: memref<1x40x8xf32, #tpu.memory_space<vmem>>, %arg6: memref<8x256xf32, #tpu.memory_space<vmem>>) attributes {dimension_semantics = [#tpu.dimension_semantics<parallel>, #tpu.dimension_semantics<parallel>], iteration_bounds = array<i64: 2, 1>, scalar_prefetch = 0 : i64, scratch_operands = 0 : i64, tpu.core_type = #tpu.core_type<tc>, window_params = [{transform_indices = @transform_0, window_bounds = array<i64: 40, 256>}, {transform_indices = @transform_1, window_bounds = array<i64: 1, 40, 8>}, {transform_indices = @transform_2, window_bounds = array<i64: 1, 40, 8>}, {transform_indices = @transform_3, window_bounds = array<i64: 1, 40, 8>}, {transform_indices = @transform_4, window_bounds = array<i64: 8, 256>}]} {
    %c0 = arith.constant 0 : index
    %c0_0 = arith.constant 0 : index
    %0 = vector.load %arg2[%c0, %c0_0] : memref<40x256xf32, #tpu.memory_space<vmem>>, vector<40x256xf32>
    %c0_1 = arith.constant 0 : index
    %c0_2 = arith.constant 0 : index
    %c0_3 = arith.constant 0 : index
    %1 = vector.load %arg3[%c0_1, %c0_2, %c0_3] : memref<1x40x8xf32, #tpu.memory_space<vmem>>, vector<1x40x8xf32>
    %2 = vector.shape_cast %1 : vector<1x40x8xf32> to vector<40x8xf32>
    %c0_4 = arith.constant 0 : index
    %c0_5 = arith.constant 0 : index
    %c0_6 = arith.constant 0 : index
    %3 = vector.load %arg4[%c0_4, %c0_5, %c0_6] : memref<1x40x8xf32, #tpu.memory_space<vmem>>, vector<1x40x8xf32>
    %4 = vector.shape_cast %3 : vector<1x40x8xf32> to vector<40x8xf32>
    %c0_7 = arith.constant 0 : index
    %c0_8 = arith.constant 0 : index
    %c0_9 = arith.constant 0 : index
    %5 = vector.load %arg5[%c0_7, %c0_8, %c0_9] : memref<1x40x8xf32, #tpu.memory_space<vmem>>, vector<1x40x8xf32>
    %6 = vector.shape_cast %5 : vector<1x40x8xf32> to vector<40x8xf32>
    %7 = vector.extract_strided_slice %2 {offsets = [0, 0], sizes = [40, 1], strides = [1, 1]} : vector<40x8xf32> to vector<40x1xf32>
    %8 = vector.extract_strided_slice %4 {offsets = [0, 0], sizes = [40, 1], strides = [1, 1]} : vector<40x8xf32> to vector<40x1xf32>
    %9 = vector.extract_strided_slice %6 {offsets = [0, 0], sizes = [40, 1], strides = [1, 1]} : vector<40x8xf32> to vector<40x1xf32>
    %10 = vector.broadcast %7 : vector<40x1xf32> to vector<40x256xf32>
    %11 = arith.subf %0, %10 : vector<40x256xf32>
    %cst = arith.constant 0.000000e+00 : f32
    %12 = vector.broadcast %cst : f32 to vector<40x256xf32>
    %13 = arith.maximumf %11, %12 : vector<40x256xf32>
    %cst_10 = arith.constant 1.000000e+00 : f32
    %14 = vector.broadcast %cst_10 : f32 to vector<40x256xf32>
    %15 = arith.minimumf %13, %14 : vector<40x256xf32>
    %16 = vector.broadcast %8 : vector<40x1xf32> to vector<40x256xf32>
    %17 = arith.subf %16, %0 : vector<40x256xf32>
    %cst_11 = arith.constant 0.000000e+00 : f32
    %18 = vector.broadcast %cst_11 : f32 to vector<40x256xf32>
    %19 = arith.maximumf %17, %18 : vector<40x256xf32>
    %cst_12 = arith.constant 1.000000e+00 : f32
    %20 = vector.broadcast %cst_12 : f32 to vector<40x256xf32>
    %21 = arith.minimumf %19, %20 : vector<40x256xf32>
    %22 = arith.mulf %15, %21 : vector<40x256xf32>
    %23 = vector.broadcast %9 : vector<40x1xf32> to vector<40x256xf32>
    %24 = arith.mulf %22, %23 : vector<40x256xf32>
    %25 = arith.mulf %24, %24 : vector<40x256xf32>
    %cst_13 = arith.constant dense<0.000000e+00> : vector<256xf32>
    %26 = vector.multi_reduction <add>, %25, %cst_13 [0] : vector<40x256xf32> to vector<256xf32>
    %27 = vector.shape_cast %26 : vector<256xf32> to vector<1x256xf32>
    %c0_14 = arith.constant 0 : index
    %c0_15 = arith.constant 0 : index
    %28 = vector.load %arg6[%c0_14, %c0_15] : memref<8x256xf32, #tpu.memory_space<vmem>>, vector<1x256xf32>
    tpu.vector_store %arg6[%c0_14, %c0_15], %27 {strides = array<i32>} : memref<8x256xf32, #tpu.memory_space<vmem>>, vector<1x256xf32>,
    %29 = vector.extract_strided_slice %2 {offsets = [0, 1], sizes = [40, 1], strides = [1, 1]} : vector<40x8xf32> to vector<40x1xf32>
    %30 = vector.extract_strided_slice %4 {offsets = [0, 1], sizes = [40, 1], strides = [1, 1]} : vector<40x8xf32> to vector<40x1xf32>
    %31 = vector.extract_strided_slice %6 {offsets = [0, 1], sizes = [40, 1], strides = [1, 1]} : vector<40x8xf32> to vector<40x1xf32>
    %32 = vector.broadcast %29 : vector<40x1xf32> to vector<40x256xf32>
    %33 = arith.subf %0, %32 : vector<40x256xf32>
    %cst_16 = arith.constant 0.000000e+00 : f32
    %34 = vector.broadcast %cst_16 : f32 to vector<40x256xf32>
    %35 = arith.maximumf %33, %34 : vector<40x256xf32>
    %cst_17 = arith.constant 1.000000e+00 : f32
    %36 = vector.broadcast %cst_17 : f32 to vector<40x256xf32>
    %37 = arith.minimumf %35, %36 : vector<40x256xf32>
    %38 = vector.broadcast %30 : vector<40x1xf32> to vector<40x256xf32>
    %39 = arith.subf %38, %0 : vector<40x256xf32>
    %cst_18 = arith.constant 0.000000e+00 : f32
    %40 = vector.broadcast %cst_18 : f32 to vector<40x256xf32>
    %41 = arith.maximumf %39, %40 : vector<40x256xf32>
    %cst_19 = arith.constant 1.000000e+00 : f32
    %42 = vector.broadcast %cst_19 : f32 to vector<40x256xf32>
    %43 = arith.minimumf %41, %42 : vector<40x256xf32>
    %44 = arith.mulf %37, %43 : vector<40x256xf32>
    %45 = vector.broadcast %31 : vector<40x1xf32> to vector<40x256xf32>
    %46 = arith.mulf %44, %45 : vector<40x256xf32>
    %47 = arith.mulf %46, %46 : vector<40x256xf32>
    %cst_20 = arith.constant dense<0.000000e+00> : vector<256xf32>
    %48 = vector.multi_reduction <add>, %47, %cst_20 [0] : vector<40x256xf32> to vector<256xf32>
    %49 = vector.shape_cast %48 : vector<256xf32> to vector<1x256xf32>
    %c1 = arith.constant 1 : index
    %c0_21 = arith.constant 0 : index
    %50 = vector.load %arg6[%c1, %c0_21] : memref<8x256xf32, #tpu.memory_space<vmem>>, vector<1x256xf32>
    tpu.vector_store %arg6[%c1, %c0_21], %49 {strides = array<i32>} : memref<8x256xf32, #tpu.memory_space<vmem>>, vector<1x256xf32>,
    %51 = vector.extract_strided_slice %2 {offsets = [0, 2], sizes = [40, 1], strides = [1, 1]} : vector<40x8xf32> to vector<40x1xf32>
    %52 = vector.extract_strided_slice %4 {offsets = [0, 2], sizes = [40, 1], strides = [1, 1]} : vector<40x8xf32> to vector<40x1xf32>
    %53 = vector.extract_strided_slice %6 {offsets = [0, 2], sizes = [40, 1], strides = [1, 1]} : vector<40x8xf32> to vector<40x1xf32>
    %54 = vector.broadcast %51 : vector<40x1xf32> to vector<40x256xf32>
    %55 = arith.subf %0, %54 : vector<40x256xf32>
    %cst_22 = arith.constant 0.000000e+00 : f32
    %56 = vector.broadcast %cst_22 : f32 to vector<40x256xf32>
    %57 = arith.maximumf %55, %56 : vector<40x256xf32>
    %cst_23 = arith.constant 1.000000e+00 : f32
    %58 = vector.broadcast %cst_23 : f32 to vector<40x256xf32>
    %59 = arith.minimumf %57, %58 : vector<40x256xf32>
    %60 = vector.broadcast %52 : vector<40x1xf32> to vector<40x256xf32>
    %61 = arith.subf %60, %0 : vector<40x256xf32>
    %cst_24 = arith.constant 0.000000e+00 : f32
    %62 = vector.broadcast %cst_24 : f32 to vector<40x256xf32>
    %63 = arith.maximumf %61, %62 : vector<40x256xf32>
    %cst_25 = arith.constant 1.000000e+00 : f32
    %64 = vector.broadcast %cst_25 : f32 to vector<40x256xf32>
    %65 = arith.minimumf %63, %64 : vector<40x256xf32>
    %66 = arith.mulf %59, %65 : vector<40x256xf32>
    %67 = vector.broadcast %53 : vector<40x1xf32> to vector<40x256xf32>
    %68 = arith.mulf %66, %67 : vector<40x256xf32>
    %69 = arith.mulf %68, %68 : vector<40x256xf32>
    %cst_26 = arith.constant dense<0.000000e+00> : vector<256xf32>
    %70 = vector.multi_reduction <add>, %69, %cst_26 [0] : vector<40x256xf32> to vector<256xf32>
    %71 = vector.shape_cast %70 : vector<256xf32> to vector<1x256xf32>
    %c2 = arith.constant 2 : index
    %c0_27 = arith.constant 0 : index
    %72 = vector.load %arg6[%c2, %c0_27] : memref<8x256xf32, #tpu.memory_space<vmem>>, vector<1x256xf32>
    tpu.vector_store %arg6[%c2, %c0_27], %71 {strides = array<i32>} : memref<8x256xf32, #tpu.memory_space<vmem>>, vector<1x256xf32>,
    %73 = vector.extract_strided_slice %2 {offsets = [0, 3], sizes = [40, 1], strides = [1, 1]} : vector<40x8xf32> to vector<40x1xf32>
    %74 = vector.extract_strided_slice %4 {offsets = [0, 3], sizes = [40, 1], strides = [1, 1]} : vector<40x8xf32> to vector<40x1xf32>
    %75 = vector.extract_strided_slice %6 {offsets = [0, 3], sizes = [40, 1], strides = [1, 1]} : vector<40x8xf32> to vector<40x1xf32>
    %76 = vector.broadcast %73 : vector<40x1xf32> to vector<40x256xf32>
    %77 = arith.subf %0, %76 : vector<40x256xf32>
    %cst_28 = arith.constant 0.000000e+00 : f32
    %78 = vector.broadcast %cst_28 : f32 to vector<40x256xf32>
    %79 = arith.maximumf %77, %78 : vector<40x256xf32>
    %cst_29 = arith.constant 1.000000e+00 : f32
    %80 = vector.broadcast %cst_29 : f32 to vector<40x256xf32>
    %81 = arith.minimumf %79, %80 : vector<40x256xf32>
    %82 = vector.broadcast %74 : vector<40x1xf32> to vector<40x256xf32>
    %83 = arith.subf %82, %0 : vector<40x256xf32>
    %cst_30 = arith.constant 0.000000e+00 : f32
    %84 = vector.broadcast %cst_30 : f32 to vector<40x256xf32>
    %85 = arith.maximumf %83, %84 : vector<40x256xf32>
    %cst_31 = arith.constant 1.000000e+00 : f32
    %86 = vector.broadcast %cst_31 : f32 to vector<40x256xf32>
    %87 = arith.minimumf %85, %86 : vector<40x256xf32>
    %88 = arith.mulf %81, %87 : vector<40x256xf32>
    %89 = vector.broadcast %75 : vector<40x1xf32> to vector<40x256xf32>
    %90 = arith.mulf %88, %89 : vector<40x256xf32>
    %91 = arith.mulf %90, %90 : vector<40x256xf32>
    %cst_32 = arith.constant dense<0.000000e+00> : vector<256xf32>
    %92 = vector.multi_reduction <add>, %91, %cst_32 [0] : vector<40x256xf32> to vector<256xf32>
    %93 = vector.shape_cast %92 : vector<256xf32> to vector<1x256xf32>
    %c3 = arith.constant 3 : index
    %c0_33 = arith.constant 0 : index
    %94 = vector.load %arg6[%c3, %c0_33] : memref<8x256xf32, #tpu.memory_space<vmem>>, vector<1x256xf32>
    tpu.vector_store %arg6[%c3, %c0_33], %93 {strides = array<i32>} : memref<8x256xf32, #tpu.memory_space<vmem>>, vector<1x256xf32>,
    %95 = vector.extract_strided_slice %2 {offsets = [0, 4], sizes = [40, 1], strides = [1, 1]} : vector<40x8xf32> to vector<40x1xf32>
    %96 = vector.extract_strided_slice %4 {offsets = [0, 4], sizes = [40, 1], strides = [1, 1]} : vector<40x8xf32> to vector<40x1xf32>
    %97 = vector.extract_strided_slice %6 {offsets = [0, 4], sizes = [40, 1], strides = [1, 1]} : vector<40x8xf32> to vector<40x1xf32>
    %98 = vector.broadcast %95 : vector<40x1xf32> to vector<40x256xf32>
    %99 = arith.subf %0, %98 : vector<40x256xf32>
    %cst_34 = arith.constant 0.000000e+00 : f32
    %100 = vector.broadcast %cst_34 : f32 to vector<40x256xf32>
    %101 = arith.maximumf %99, %100 : vector<40x256xf32>
    %cst_35 = arith.constant 1.000000e+00 : f32
    %102 = vector.broadcast %cst_35 : f32 to vector<40x256xf32>
    %103 = arith.minimumf %101, %102 : vector<40x256xf32>
    %104 = vector.broadcast %96 : vector<40x1xf32> to vector<40x256xf32>
    %105 = arith.subf %104, %0 : vector<40x256xf32>
    %cst_36 = arith.constant 0.000000e+00 : f32
    %106 = vector.broadcast %cst_36 : f32 to vector<40x256xf32>
    %107 = arith.maximumf %105, %106 : vector<40x256xf32>
    %cst_37 = arith.constant 1.000000e+00 : f32
    %108 = vector.broadcast %cst_37 : f32 to vector<40x256xf32>
    %109 = arith.minimumf %107, %108 : vector<40x256xf32>
    %110 = arith.mulf %103, %109 : vector<40x256xf32>
    %111 = vector.broadcast %97 : vector<40x1xf32> to vector<40x256xf32>
    %112 = arith.mulf %110, %111 : vector<40x256xf32>
    %113 = arith.mulf %112, %112 : vector<40x256xf32>
    %cst_38 = arith.constant dense<0.000000e+00> : vector<256xf32>
    %114 = vector.multi_reduction <add>, %113, %cst_38 [0] : vector<40x256xf32> to vector<256xf32>
    %115 = vector.shape_cast %114 : vector<256xf32> to vector<1x256xf32>
    %c4 = arith.constant 4 : index
    %c0_39 = arith.constant 0 : index
    %116 = vector.load %arg6[%c4, %c0_39] : memref<8x256xf32, #tpu.memory_space<vmem>>, vector<1x256xf32>
    tpu.vector_store %arg6[%c4, %c0_39], %115 {strides = array<i32>} : memref<8x256xf32, #tpu.memory_space<vmem>>, vector<1x256xf32>,
    %117 = vector.extract_strided_slice %2 {offsets = [0, 5], sizes = [40, 1], strides = [1, 1]} : vector<40x8xf32> to vector<40x1xf32>
    %118 = vector.extract_strided_slice %4 {offsets = [0, 5], sizes = [40, 1], strides = [1, 1]} : vector<40x8xf32> to vector<40x1xf32>
    %119 = vector.extract_strided_slice %6 {offsets = [0, 5], sizes = [40, 1], strides = [1, 1]} : vector<40x8xf32> to vector<40x1xf32>
    %120 = vector.broadcast %117 : vector<40x1xf32> to vector<40x256xf32>
    %121 = arith.subf %0, %120 : vector<40x256xf32>
    %cst_40 = arith.constant 0.000000e+00 : f32
    %122 = vector.broadcast %cst_40 : f32 to vector<40x256xf32>
    %123 = arith.maximumf %121, %122 : vector<40x256xf32>
    %cst_41 = arith.constant 1.000000e+00 : f32
    %124 = vector.broadcast %cst_41 : f32 to vector<40x256xf32>
    %125 = arith.minimumf %123, %124 : vector<40x256xf32>
    %126 = vector.broadcast %118 : vector<40x1xf32> to vector<40x256xf32>
    %127 = arith.subf %126, %0 : vector<40x256xf32>
    %cst_42 = arith.constant 0.000000e+00 : f32
    %128 = vector.broadcast %cst_42 : f32 to vector<40x256xf32>
    %129 = arith.maximumf %127, %128 : vector<40x256xf32>
    %cst_43 = arith.constant 1.000000e+00 : f32
    %130 = vector.broadcast %cst_43 : f32 to vector<40x256xf32>
    %131 = arith.minimumf %129, %130 : vector<40x256xf32>
    %132 = arith.mulf %125, %131 : vector<40x256xf32>
    %133 = vector.broadcast %119 : vector<40x1xf32> to vector<40x256xf32>
    %134 = arith.mulf %132, %133 : vector<40x256xf32>
    %135 = arith.mulf %134, %134 : vector<40x256xf32>
    %cst_44 = arith.constant dense<0.000000e+00> : vector<256xf32>
    %136 = vector.multi_reduction <add>, %135, %cst_44 [0] : vector<40x256xf32> to vector<256xf32>
    %137 = vector.shape_cast %136 : vector<256xf32> to vector<1x256xf32>
    %c5 = arith.constant 5 : index
    %c0_45 = arith.constant 0 : index
    %138 = vector.load %arg6[%c5, %c0_45] : memref<8x256xf32, #tpu.memory_space<vmem>>, vector<1x256xf32>
    tpu.vector_store %arg6[%c5, %c0_45], %137 {strides = array<i32>} : memref<8x256xf32, #tpu.memory_space<vmem>>, vector<1x256xf32>,
    %139 = vector.extract_strided_slice %2 {offsets = [0, 6], sizes = [40, 1], strides = [1, 1]} : vector<40x8xf32> to vector<40x1xf32>
    %140 = vector.extract_strided_slice %4 {offsets = [0, 6], sizes = [40, 1], strides = [1, 1]} : vector<40x8xf32> to vector<40x1xf32>
    %141 = vector.extract_strided_slice %6 {offsets = [0, 6], sizes = [40, 1], strides = [1, 1]} : vector<40x8xf32> to vector<40x1xf32>
    %142 = vector.broadcast %139 : vector<40x1xf32> to vector<40x256xf32>
    %143 = arith.subf %0, %142 : vector<40x256xf32>
    %cst_46 = arith.constant 0.000000e+00 : f32
    %144 = vector.broadcast %cst_46 : f32 to vector<40x256xf32>
    %145 = arith.maximumf %143, %144 : vector<40x256xf32>
    %cst_47 = arith.constant 1.000000e+00 : f32
    %146 = vector.broadcast %cst_47 : f32 to vector<40x256xf32>
    %147 = arith.minimumf %145, %146 : vector<40x256xf32>
    %148 = vector.broadcast %140 : vector<40x1xf32> to vector<40x256xf32>
    %149 = arith.subf %148, %0 : vector<40x256xf32>
    %cst_48 = arith.constant 0.000000e+00 : f32
    %150 = vector.broadcast %cst_48 : f32 to vector<40x256xf32>
    %151 = arith.maximumf %149, %150 : vector<40x256xf32>
    %cst_49 = arith.constant 1.000000e+00 : f32
    %152 = vector.broadcast %cst_49 : f32 to vector<40x256xf32>
    %153 = arith.minimumf %151, %152 : vector<40x256xf32>
    %154 = arith.mulf %147, %153 : vector<40x256xf32>
    %155 = vector.broadcast %141 : vector<40x1xf32> to vector<40x256xf32>
    %156 = arith.mulf %154, %155 : vector<40x256xf32>
    %157 = arith.mulf %156, %156 : vector<40x256xf32>
    %cst_50 = arith.constant dense<0.000000e+00> : vector<256xf32>
    %158 = vector.multi_reduction <add>, %157, %cst_50 [0] : vector<40x256xf32> to vector<256xf32>
    %159 = vector.shape_cast %158 : vector<256xf32> to vector<1x256xf32>
    %c6 = arith.constant 6 : index
    %c0_51 = arith.constant 0 : index
    %160 = vector.load %arg6[%c6, %c0_51] : memref<8x256xf32, #tpu.memory_space<vmem>>, vector<1x256xf32>
    tpu.vector_store %arg6[%c6, %c0_51], %159 {strides = array<i32>} : memref<8x256xf32, #tpu.memory_space<vmem>>, vector<1x256xf32>,
    %161 = vector.extract_strided_slice %2 {offsets = [0, 7], sizes = [40, 1], strides = [1, 1]} : vector<40x8xf32> to vector<40x1xf32>
    %162 = vector.extract_strided_slice %4 {offsets = [0, 7], sizes = [40, 1], strides = [1, 1]} : vector<40x8xf32> to vector<40x1xf32>
    %163 = vector.extract_strided_slice %6 {offsets = [0, 7], sizes = [40, 1], strides = [1, 1]} : vector<40x8xf32> to vector<40x1xf32>
    %164 = vector.broadcast %161 : vector<40x1xf32> to vector<40x256xf32>
    %165 = arith.subf %0, %164 : vector<40x256xf32>
    %cst_52 = arith.constant 0.000000e+00 : f32
    %166 = vector.broadcast %cst_52 : f32 to vector<40x256xf32>
    %167 = arith.maximumf %165, %166 : vector<40x256xf32>
    %cst_53 = arith.constant 1.000000e+00 : f32
    %168 = vector.broadcast %cst_53 : f32 to vector<40x256xf32>
    %169 = arith.minimumf %167, %168 : vector<40x256xf32>
    %170 = vector.broadcast %162 : vector<40x1xf32> to vector<40x256xf32>
    %171 = arith.subf %170, %0 : vector<40x256xf32>
    %cst_54 = arith.constant 0.000000e+00 : f32
    %172 = vector.broadcast %cst_54 : f32 to vector<40x256xf32>
    %173 = arith.maximumf %171, %172 : vector<40x256xf32>
    %cst_55 = arith.constant 1.000000e+00 : f32
    %174 = vector.broadcast %cst_55 : f32 to vector<40x256xf32>
    %175 = arith.minimumf %173, %174 : vector<40x256xf32>
    %176 = arith.mulf %169, %175 : vector<40x256xf32>
    %177 = vector.broadcast %163 : vector<40x1xf32> to vector<40x256xf32>
    %178 = arith.mulf %176, %177 : vector<40x256xf32>
    %179 = arith.mulf %178, %178 : vector<40x256xf32>
    %cst_56 = arith.constant dense<0.000000e+00> : vector<256xf32>
    %180 = vector.multi_reduction <add>, %179, %cst_56 [0] : vector<40x256xf32> to vector<256xf32>
    %181 = vector.shape_cast %180 : vector<256xf32> to vector<1x256xf32>
    %c7 = arith.constant 7 : index
    %c0_57 = arith.constant 0 : index
    %182 = vector.load %arg6[%c7, %c0_57] : memref<8x256xf32, #tpu.memory_space<vmem>>, vector<1x256xf32>
    tpu.vector_store %arg6[%c7, %c0_57], %181 {strides = array<i32>} : memref<8x256xf32, #tpu.memory_space<vmem>>, vector<1x256xf32>,
    return
  }
  func.func @transform_0(%arg0: i32, %arg1: i32) -> (i32, i32) {
    %c0_i32 = arith.constant 0 : i32
    %c0_i32_0 = arith.constant 0 : i32
    return %c0_i32, %arg0 : i32, i32
  }
  func.func @transform_1(%arg0: i32, %arg1: i32) -> (i32, i32, i32) {
    %c0_i32 = arith.constant 0 : i32
    %c0_i32_0 = arith.constant 0 : i32
    %c0_i32_1 = arith.constant 0 : i32
    return %arg1, %c0_i32, %c0_i32_0 : i32, i32, i32
  }
  func.func @transform_2(%arg0: i32, %arg1: i32) -> (i32, i32, i32) {
    %c0_i32 = arith.constant 0 : i32
    %c0_i32_0 = arith.constant 0 : i32
    %c0_i32_1 = arith.constant 0 : i32
    return %arg1, %c0_i32, %c0_i32_0 : i32, i32, i32
  }
  func.func @transform_3(%arg0: i32, %arg1: i32) -> (i32, i32, i32) {
    %c0_i32 = arith.constant 0 : i32
    %c0_i32_0 = arith.constant 0 : i32
    %c0_i32_1 = arith.constant 0 : i32
    return %arg1, %c0_i32, %c0_i32_0 : i32, i32, i32
  }
  func.func @transform_4(%arg0: i32, %arg1: i32) -> (i32, i32) {
    %c0_i32 = arith.constant 0 : i32
    return %arg1, %arg0 : i32, i32
  }
}

</mosaic_0001>

<bundles_post_ra>
// kernel: tpu_custom_call.1
= control target key start
LH: loop header
LB: loop body
LE: loop exit
PB: predicated region body
PF: predicated region fallthrough
CT: control target
= control target key end

     0   :  { %9 = vsyncpa [#allocation3], 0  ;;  %s3008_s0 = inlined_call_operand.hbm [shape: f32[40,512], index: 0, kind: input, shape index: {}]   ;;  %s3009_s1 = inlined_call_operand.vmem [shape: f32[1,40,8], index: 1, kind: input, shape index: {}]   ;;  %s3010_s2 = inlined_call_operand.vmem [shape: f32[1,40,8], index: 2, kind: input, shape index: {}]   ;;  %s3011_s3 = inlined_call_operand.vmem [shape: f32[1,40,8], index: 3, kind: input, shape index: {}]   ;;  %s3012_s4 = inlined_call_operand.hbm [shape: f32[8,512], index: 4, kind: output, shape index: {}]  }
   0x1   :  { %11 = vsyncpa [#allocation3 + $0x1], 0 }
   0x2   :  { %12 = vsyncpa [#allocation4], 0 }
   0x3   :  { %14 = vsyncpa [#allocation4 + $0x1], 0  ;;  %s2206_s15 = smov 0   ;;  %s2208_s16 = smov 0  }
   0x4   :  { %s2210_s17 = smov 0   ;;  %s2212_s18 = smov 0  }
   0x5   :  { %s2214_s19 = smov 0   ;;  %s2216_s20 = smov 0  }
   0x6 LB: > { %s1907_s21 = sadd.s32 4294967295, %s2168_s20   ;;  %s1908_s22 = sadd.s32 4294967294, %s2168_s20   ;;  %s2168_s20 = sphi %s2216_s20, %s20_s20   ;;  %s2164_s19 = sphi %s2214_s19, %s3031_s19   ;;  %s2160_s18 = sphi %s2212_s18, %s3030_s18   ;;  %s2156_s17 = sphi %s2210_s17, %s3029_s17   ;;  %s2152_s16 = sphi %s2208_s16, %s3028_s16   ;;  %s2148_s15 = sphi %s2206_s15, %s3027_s15  }
   0x7   : > { %s32_s23 = sadd.s32 1, %s2164_s19  ;;  %s39_s24 = sadd.s32 1, %s2156_s17 }
   0x8   : > { %p34_p0 = scmp.ge.s32.totalorder %s32_s23, 2  ;;  %p46_p1 = scmp.ne.s32.totalorder %s2156_s17, %s2152_s16 }
   0x9   : > { %p47_p2 = scmp.eq.s32.totalorder %s2168_s20, 0  ;;  %p52_p3 = scmp.ne.s32.totalorder %s2152_s16, %s2148_s15 }
   0xa   : > { %s3033_s23 = smov (%p34_p0, %s32_s23), 0  ;;  %p53_p5 = scmp.eq.s32.totalorder %s1907_s21, 0 }
   0xb   : > { %p2247_p4 = por %p47_p2, %p46_p1  ;;  %s36_s26 = ssub.s32 %s2164_s19, %s3033_s23 }
   0xc   : > { %p156_p6 = scmp.eq.s32.totalorder %s1907_s21, 1  ;;  %p37_p7 = scmp.eq.s32.totalorder %s36_s26, 0 }
   0xd   : > { %p2253_p8 = por %p53_p5, %p52_p3  ;;  %p162_p10 = scmp.eq.s32.totalorder %s1908_s22, 1 }
   0xe   : > { %p2257_p9 = por %p156_p6, %p46_p1  ;;  %p1913_p12 = scmp.ge.s32.totalorder %s2168_s20, 2 }
   0xf   : > { %s2262_s29 = scalar_select %p37_p7, %s2156_s17, %s39_s24  }
  0x10   : > { %p2264_p11 = por %p162_p10, %p52_p3  ;;  %p1946_p13 = scmp.lt.s32.totalorder %s2168_s20, 2 }
  0x11   : > { %s206_s5 = sand.u32 1, %s2156_s17   ;;  %s1930_s7 = sshll.u32 %s2164_s19, 4 }
  0x12   : > { %s1932_s6 = smul.u32 80, %s206_s5  ;;  %p1939_p0 = pnand %p1946_p13, %p2247_p4 }
  0x13   : > { %s215_s10 = scalar_lea.hbm %s3008_s0, %s1930_s7  ;;  %s207_s14 = scalar_lea.sflag [#allocation3], %s206_s5 }
  0x14   : > { %s216_s11 = sshll.u32 %s215_s10, 4  ;;  %s210_s12 = scalar_lea.vmem [#allocation2], %s1932_s6  ;;  %s217_s11 = int_to_ptr.hbm [resolvable:$true] %s216_s11 }
  0x15   : > { %s218_s13 = sshll.u32 %s210_s12, 4  ;;  %s2170_s21 = smov 512   ;;  %s219_s13 = int_to_ptr.vmem [resolvable:$true] %s218_s13 }
  0x16   : > { %s2171_s22 = smov 256   ;;  %s2172_s24 = smov 16  }
  0x17   : > { %1941 = dma.hbm_to_vmem [thread:$0]  (!%p1939_p0), %s217_s11, 1280, %s219_s13, %s207_s14, %s2170_s21, %s2171_s22, %s2172_s24  }
  0x18   : > { %p1916_p1 = scmp.ge.s32.totalorder %s2168_s20, 1  ;;  %p226_p2 = scmp.lt.s32.totalorder %s2168_s20, 3 }
  0x1a   : > { %p227_p3 = pnand %p1916_p1, %p226_p2 }
  0x1c   : > { %230 = sbr.rel (%p227_p3) target bundleno = 520 (0x208), region = 36 }
  0x21   : > { %s2280_s25 = sand.u32 1, %s2152_s16  }
  0x22   : > { %s1933_s26 = smul.u32 80, %s2280_s25  ;;  %s233_s6 = scalar_lea.sflag [#allocation3], %s2280_s25 }
  0x24   : > { %s2284_s7 = scalar_lea.vmem [#allocation2], %s1933_s26 }
  0x25   : > { %2139 = dma.done.wait (%p2253_p8), %s233_s6, 1280  }
  0x26   : > { %2141 = vsyncadd (%p2253_p8), %s233_s6, 4294966016  ;;  %v2173_v0 = vmov 0   ;;  %v2293_v1 = vld [vmem:[%s3009_s1 + $0x20] sm:$0xff]  ;;  %v2298_v2 = vld [vmem:[%s3009_s1 + $0x10] sm:$0xff]  ;;  %v2174_v16 = vmov 1   ;;  %v2175_v17 = vmov 2  }
  0x27   : > { %2009 = vset.pattern.permute.xlu2 %v2173_v0  ;;  %2008 = vset.pattern.permute.xlu1 %v2173_v0  ;;  %v2303_v3 = vld [vmem:[%s3009_s1] sm:$0xff]  ;;  %v2316_v5 = vld [vmem:[%s3009_s1 + $0x18] sm:$0xff]  ;;  %v2321_v6 = vld [vmem:[%s3009_s1 + $0x8] sm:$0xff]  ;;  %v2176_v24 = vmov 3   ;;  %s1917_s9 = sshll.u32 %s2280_s25, 4  ;;  %vm507_vm0 = vcmask 1040384  }
  0x28   : > { %2007 = vset.pattern.permute.xlu0 %v2173_v0  ;;  %341 = vperm.xlu2 %2009, %v2293_v1   ;;  %v2311_v4 = vld [vmem:[%s3010_s2] sm:$0xff]  ;;  %v2329_v7 = vld [vmem:[%s3010_s2 + $0x18] sm:$0xff]  ;;  %v2334_v8 = vld [vmem:[%s3010_s2 + $0x10] sm:$0xff]  ;;  %s2534_s10 = scalar_lea.vmem [#allocation5], %s1917_s9  ;;  %s1931_s13 = sshll.u32 %s2160_s18, 4 }
  0x29   : > { %331 = vperm.xlu1 %2008, %v2298_v2   ;;  %321 = vperm.xlu0 %2007, %v2303_v3   ;;  %v2339_v9 = vld [vmem:[%s3010_s2 + $0x8] sm:$0xff]  ;;  %v2352_v11 = vld [vmem:[%s3011_s3] sm:$0xff]  ;;  %v2370_v14 = vld [vmem:[%s3011_s3 + $0x18] sm:$0xff]  ;;  %s1776_s22 = scalar_lea.hbm %s3012_s4, %s1931_s13  ;;  %s1778_s24 = sshll.u32 %s2534_s10, 4  ;;  %s1779_s24 = int_to_ptr.vmem [resolvable:$true] %s1778_s24 }
  0x2a   : > { %3021 = vst [vmem:[#allocation8_spill] sm:$0xff] %v2339_v9  ;;  %v2347_v10 = vld [vmem:[%s3011_s3 + $0x8] sm:$0xff]  ;;  %v2357_v12 = vld [vmem:[%s3010_s2 + $0x20] sm:$0xff]  ;;  %v2375_v15 = vld [vmem:[%s3011_s3 + $0x10] sm:$0xff]  ;;  %s1780_s26 = sshll.u32 %s1776_s22, 4  ;;  %s1763_s18 = scalar_lea.sflag [#allocation4], %s2280_s25  ;;  %s1781_s26 = int_to_ptr.hbm [resolvable:$true] %s1780_s26 }
  0x2b   : > { %3022 = vst [vmem:[#allocation9_spill] sm:$0xff] %v2357_v12  ;;  %v2365_v13 = vld [vmem:[%s3011_s3 + $0x20] sm:$0xff]  ;;  %v2420_v26 = vld [vmem:[%s2284_s7 + $0x8] sm:$0xff]  ;;  %v2428_v30 = vld [vmem:[%s2284_s7 + $0x18] sm:$0xff]  ;;  %s2100_s6 = sshra.s32 %s1781_s26, 4  ;;  %s2106_s9 = scalar_lea.hbm %s3012_s4, 32  ;;  %s2101_s6 = int_to_ptr.hbm [resolvable:$true] %s2100_s6 }
  0x2c   : > { %v2417_v25 = vld [vmem:[%s2284_s7] sm:$0xff]  ;;  %v2425_v29 = vld [vmem:[%s2284_s7 + $0x10] sm:$0xff]  ;;  %v2441_v37 = vld [vmem:[%s2284_s7 + $0x38] sm:$0xff]  ;;  %s2102_s5 = scalar_lea.hbm %s2101_s6, 16  ;;  %p2107_p7 = scmp.lt.s32.totalorder %s2101_s6, %s3012_s4 }
  0x2d   : > { %v2438_v36 = vld [vmem:[%s2284_s7 + $0x30] sm:$0xff]  ;;  %v2444_v38 = vld [vmem:[%s2284_s7 + $0x40] sm:$0xff]  ;;  %v2447_v39 = vld [vmem:[%s2284_s7 + $0x48] sm:$0xff]  ;;  %p2103_p4 = scmp.ne.s32.totalorder %s2101_s6, %s2102_s5  ;;  %p2108_p8 = scmp.lt.s32.totalorder %s2106_s9, %s2102_s5 }
  0x2e   : > { %v2460_v57 = vld [vmem:[%s2284_s7 + $0x20] sm:$0xff]  ;;  %v2463_v58 = vld [vmem:[%s2284_s7 + $0x28] sm:$0xff] }
  0x2f   : > { %p2104_p5 = pnand %p2103_p4, %p2257_p9  ;;  %p2109_p10 = por %p2108_p8, %p2107_p7 }
  0x30   : > { %376 = vperm.xlu2 %2009, %v2311_v4  }
  0x31   : > { %336 = vperm.xlu1 %2008, %v2316_v5   ;;  %326 = vperm.xlu0 %2007, %v2321_v6   ;;  %p2105_p6 = pneg %p2104_p5 }
  0x33   : > { %p2110_p13 = pnand %p2109_p10, %p2105_p6 }
  0x38   : > { %391 = vperm.xlu2 %2009, %v2329_v7  }
  0x39   : > { %386 = vperm.xlu1 %2008, %v2334_v8   ;;  %381 = vperm.xlu0 %2007, %v2339_v9  }
  0x40   : > { %446 = vperm.xlu2 %2009, %v2347_v10  }
  0x41   : > { %441 = vperm.xlu1 %2008, %v2352_v11   ;;  %396 = vperm.xlu0 %2007, %v2357_v12  }
  0x48   : > { %461 = vperm.xlu2 %2009, %v2365_v13  }
  0x49   : > { %456 = vperm.xlu1 %2008, %v2370_v14   ;;  %451 = vperm.xlu0 %2007, %v2375_v15  }
  0x50   : > { %2012 = vset.pattern.permute.xlu2 %v2174_v16 }
  0x51   : > { %2011 = vset.pattern.permute.xlu1 %v2174_v16  ;;  %2010 = vset.pattern.permute.xlu0 %v2174_v16 }
  0x52   : > { %525 = vperm.xlu2 %2012, %v2298_v2   ;;  %521 = vperm.xlu1 %2011, %v2321_v6  }
  0x53   : > { %517 = vperm.xlu0 %2010, %v2303_v3  }
  0x5a   : > { %533 = vperm.xlu2 %2012, %v2293_v1   ;;  %529 = vperm.xlu1 %2011, %v2316_v5  }
  0x5b   : > { %567 = vperm.xlu0 %2010, %v2311_v4  }
  0x62   : > { %575 = vperm.xlu2 %2012, %v2334_v8   ;;  %571 = vperm.xlu1 %2011, %v2339_v9  }
  0x63   : > { %579 = vperm.xlu0 %2010, %v2329_v7  }
  0x6a   : > { %627 = vperm.xlu2 %2012, %v2352_v11   ;;  %583 = vperm.xlu1 %2011, %v2357_v12  }
  0x6b   : > { %631 = vperm.xlu0 %2010, %v2347_v10  }
  0x72   : > { %639 = vperm.xlu2 %2012, %v2370_v14   ;;  %635 = vperm.xlu1 %2011, %v2375_v15  }
  0x73   : > { %643 = vperm.xlu0 %2010, %v2365_v13  }
  0x7a   : > { %2014 = vset.pattern.permute.xlu2 %v2175_v17  ;;  %2013 = vset.pattern.permute.xlu1 %v2175_v17 }
  0x7b   : > { %2015 = vset.pattern.permute.xlu0 %v2175_v17  ;;  %699 = vperm.xlu2 %2014, %v2321_v6  }
  0x7c   : > { %695 = vperm.xlu1 %2013, %v2303_v3   ;;  %703 = vperm.xlu0 %2015, %v2298_v2  }
  0x82   : > { %v2398_v18 = vpop.permute.xlu2 %341 }
  0x83   : > { %711 = vperm.xlu2 %2014, %v2293_v1   ;;  %v352_v48 = vsub.f32 %v2444_v38, %v2398_v18  ;;  %v353_v49 = vsub.f32 %v2447_v39, %v2398_v18 }
  0x84   : > { %707 = vperm.xlu1 %2013, %v2316_v5   ;;  %753 = vperm.xlu0 %2015, %v2334_v8  }
  0x8a   : > { %v377_v19 = vpop.permute.xlu2 %376 }
  0x8b   : > { %749 = vperm.xlu2 %2014, %v2339_v9   ;;  %v399_v31 = vsub.f32 %v377_v19, %v2417_v25  ;;  %v400_v32 = vsub.f32 %v377_v19, %v2420_v26 }
  0x8c   : > { %745 = vperm.xlu1 %2013, %v2311_v4   ;;  %805 = vperm.xlu0 %2015, %v2352_v11  }
  0x8d   : > { %v409_v40 = vmax.f32 %v399_v31, 0.0  ;;  %v410_v41 = vmax.f32 %v400_v32, 0.0 }
  0x8f   : > { %v419_v51 = vmin.f32 %v409_v40, 1.0  ;;  %v420_v52 = vmin.f32 %v410_v41, 1.0  ;;  %v362_v41 = vmax.f32 %v352_v48, 0.0 }
  0x92   : > { %v392_v20 = vpop.permute.xlu2 %391 }
  0x93   : > { %761 = vperm.xlu2 %2014, %v2357_v12   ;;  %v405_v44 = vsub.f32 %v392_v20, %v2438_v36  ;;  %v406_v45 = vsub.f32 %v392_v20, %v2441_v37 }
  0x94   : > { %757 = vperm.xlu1 %2013, %v2329_v7   ;;  %817 = vperm.xlu0 %2015, %v2370_v14  }
  0x95   : > { %v415_v63 = vmax.f32 %v405_v44, 0.0  ;;  %v416_v0 = vmax.f32 %v406_v45, 0.0 }
  0x97   : > { %v426_v44 = vmin.f32 %v416_v0, 1.0 }
  0x9a   : > { %v2409_v21 = vpop.permute.xlu2 %446 }
  0x9b   : > { %v2411_v22 = vpop.permute.xlu1 %331  ;;  %813 = vperm.xlu2 %2014, %v2375_v15   ;;  %v322_v23 = vpop.permute.xlu0 %321 }
  0x9c   : > { %809 = vperm.xlu1 %2013, %v2347_v10   ;;  %2017 = vset.pattern.permute.xlu0 %v2176_v24  ;;  %v344_v42 = vsub.f32 %v2417_v25, %v322_v23  ;;  %v345_v43 = vsub.f32 %v2420_v26, %v322_v23 }
  0x9d   : > { %877 = vperm.xlu0 %2017, %v2321_v6  }
  0x9e   : > { %v354_v53 = vmax.f32 %v344_v42, 0.0  ;;  %v355_v54 = vmax.f32 %v345_v43, 0.0  ;;  %v363_v42 = vmax.f32 %v353_v49, 0.0  ;;  %v425_v43 = vmin.f32 %v415_v63, 1.0 }
  0xa0   : > { %v364_v31 = vmin.f32 %v354_v53, 1.0  ;;  %v365_v32 = vmin.f32 %v355_v54, 1.0 }
  0xa2   : > { %v2422_v27 = vpop.permute.xlu2 %461 }
  0xa3   : > { %v337_v28 = vpop.permute.xlu1 %336  ;;  %2016 = vset.pattern.permute.xlu2 %v2176_v24  ;;  %v327_v33 = vpop.permute.xlu0 %326 }
  0xa4   : > { %821 = vperm.xlu1 %2013, %v2365_v13   ;;  %873 = vperm.xlu2 %2016, %v2303_v3   ;;  %v346_v34 = vsub.f32 %v2425_v29, %v327_v33  ;;  %v347_v35 = vsub.f32 %v2428_v30, %v327_v33  ;;  %v350_v59 = vsub.f32 %v2438_v36, %v337_v28 }
  0xa5   : > { %927 = vperm.xlu0 %2017, %v2339_v9   ;;  %v351_v60 = vsub.f32 %v2441_v37, %v337_v28  ;;  %v349_v28 = vsub.f32 %v2463_v58, %v2411_v22  ;;  %v430_v9 = vmul.f32 %v420_v52, %v365_v32 }
  0xa6   : > { %v356_v46 = vmax.f32 %v346_v34, 0.0  ;;  %v357_v47 = vmax.f32 %v347_v35, 0.0  ;;  %v360_v33 = vmax.f32 %v350_v59, 0.0 }
  0xa7   : > { %v361_v34 = vmax.f32 %v351_v60, 0.0 }
  0xa8   : > { %v366_v16 = vmin.f32 %v356_v46, 1.0  ;;  %v367_v17 = vmin.f32 %v357_v47, 1.0  ;;  %v370_v54 = vmin.f32 %v360_v33, 1.0 }
  0xa9   : > { %v371_v59 = vmin.f32 %v361_v34, 1.0 }
  0xab   : > { %v387_v50 = vpop.permute.xlu1 %386  ;;  %v382_v55 = vpop.permute.xlu0 %381 }
  0xac   : > { %2018 = vset.pattern.permute.xlu1 %v2176_v24  ;;  %v2457_v56 = vpop.permute.xlu2 %525  ;;  %v401_v61 = vsub.f32 %v382_v55, %v2425_v29  ;;  %v402_v62 = vsub.f32 %v382_v55, %v2428_v30  ;;  %885 = vperm.xlu2 %2016, %v2316_v5   ;;  %v403_v18 = vsub.f32 %v387_v50, %v2460_v57 }
  0xad   : > { %881 = vperm.xlu1 %2018, %v2298_v2   ;;  %939 = vperm.xlu0 %2017, %v2357_v12   ;;  %v404_v19 = vsub.f32 %v387_v50, %v2463_v58  ;;  %v348_v24 = vsub.f32 %v2460_v57, %v2411_v22  ;;  %v429_v12 = vmul.f32 %v419_v51, %v364_v31 }
  0xae   : > { %v411_v20 = vmax.f32 %v401_v61, 0.0  ;;  %v412_v23 = vmax.f32 %v402_v62, 0.0  ;;  %v413_v45 = vmax.f32 %v403_v18, 0.0  ;;  %v359_v62 = vmax.f32 %v349_v28, 0.0 }
  0xaf   : > { %v414_v46 = vmax.f32 %v404_v19, 0.0  ;;  %v358_v61 = vmax.f32 %v348_v24, 0.0  ;;  %v372_v19 = vmin.f32 %v362_v41, 1.0 }
  0xb0   : > { %v421_v35 = vmin.f32 %v411_v20, 1.0  ;;  %v422_v40 = vmin.f32 %v412_v23, 1.0  ;;  %v423_v51 = vmin.f32 %v413_v45, 1.0  ;;  %v373_v20 = vmin.f32 %v363_v42, 1.0 }
  0xb1   : > { %v424_v52 = vmin.f32 %v414_v46, 1.0  ;;  %v368_v23 = vmin.f32 %v358_v61, 1.0  ;;  %v369_v24 = vmin.f32 %v359_v62, 1.0 }
  0xb2   : > { %v431_v47 = vmul.f32 %v421_v35, %v366_v16  ;;  %v432_v50 = vmul.f32 %v422_v40, %v367_v17 }
  0xb3   : > { %v442_v55 = vpop.permute.xlu1 %441  ;;  %v397_v22 = vpop.permute.xlu0 %396  ;;  %v433_v46 = vmul.f32 %v423_v51, %v368_v23 }
  0xb4   : > { %v2478_v53 = vpop.permute.xlu2 %533  ;;  %v407_v60 = vsub.f32 %v397_v22, %v2444_v38  ;;  %v408_v48 = vsub.f32 %v397_v22, %v2447_v39  ;;  %923 = vperm.xlu2 %2016, %v2311_v4   ;;  %v464_v49 = vmul.f32 %v442_v55, %v429_v12  ;;  %v465_v63 = vmul.f32 %v442_v55, %v430_v9 }
  0xb5   : > { %v466_v0 = vmul.f32 %v2409_v21, %v431_v47  ;;  %v467_v16 = vmul.f32 %v2409_v21, %v432_v50  ;;  %889 = vperm.xlu1 %2018, %v2293_v1   ;;  %991 = vperm.xlu0 %2017, %v2375_v15   ;;  %v435_v12 = vmul.f32 %v425_v43, %v370_v54 }
  0xb6   : > { %v417_v17 = vmax.f32 %v407_v60, 0.0  ;;  %v418_v18 = vmax.f32 %v408_v48, 0.0  ;;  %v436_v9 = vmul.f32 %v426_v44, %v371_v59  ;;  %v474_v32 = vmul.f32 %v464_v49, %v464_v49 }
  0xb7   : > { %v475_v33 = vmul.f32 %v465_v63, %v465_v63  ;;  %v476_v34 = vmul.f32 %v466_v0, %v466_v0  ;;  %v477_v21 = vmul.f32 %v467_v16, %v467_v16  ;;  %v434_v47 = vmul.f32 %v424_v52, %v369_v24 }
  0xb8   : > { %v427_v28 = vmin.f32 %v417_v17, 1.0  ;;  %v428_v31 = vmin.f32 %v418_v18, 1.0  ;;  %v2177_v48 = vmov 4  }
  0xb9   : > { %v484_v43 = vadd.f32 %v476_v34, %v474_v32  ;;  %v494_v44 = vadd.f32 %v477_v21, %v475_v33 }
  0xba   : > { %v437_v35 = vmul.f32 %v427_v28, %v372_v19  ;;  %v438_v40 = vmul.f32 %v428_v31, %v373_v20 }
  0xbb   : > { %v457_v45 = vpop.permute.xlu1 %456  ;;  %v452_v50 = vpop.permute.xlu0 %451 }
  0xbc   : > { %v2487_v55 = vpop.permute.xlu2 %575  ;;  %v470_v41 = vmul.f32 %v457_v45, %v435_v12  ;;  %v471_v42 = vmul.f32 %v457_v45, %v436_v9  ;;  %v468_v61 = vmul.f32 %v452_v50, %v433_v46  ;;  %v469_v62 = vmul.f32 %v452_v50, %v434_v47  ;;  %935 = vperm.xlu2 %2016, %v2329_v7  }
  0xbd   : > { %931 = vperm.xlu1 %2018, %v2334_v8   ;;  %v472_v22 = vmul.f32 %v2422_v27, %v437_v35  ;;  %v473_v54 = vmul.f32 %v2422_v27, %v438_v40  ;;  %2019 = vset.pattern.permute.xlu0 %v2177_v48  ;;  %v540_v46 = vsub.f32 %v2460_v57, %v2457_v56  ;;  %v510_v50 = vlaneseq }
  0xbe   : > { %v478_v59 = vmul.f32 %v468_v61, %v468_v61  ;;  %v479_v60 = vmul.f32 %v469_v62, %v469_v62  ;;  %1051 = vperm.xlu0 %2019, %v2303_v3   ;;  %v480_v49 = vmul.f32 %v470_v41, %v470_v41  ;;  %v481_v63 = vmul.f32 %v471_v42, %v471_v42 }
  0xbf   : > { %v482_v51 = vmul.f32 %v472_v22, %v472_v22  ;;  %v483_v52 = vmul.f32 %v473_v54, %v473_v54  ;;  %v541_v47 = vsub.f32 %v2463_v58, %v2457_v56  ;;  %vm2522_vm1 = vcmp.lt.s32.totalorder %v510_v50, 256 }
  0xc0   : > { %v485_v0 = vadd.f32 %v484_v43, %v478_v59  ;;  %v495_v16 = vadd.f32 %v494_v44, %v479_v60  ;;  %v2518_v59 = vmax.f32 %v540_v46, 0.0 }
  0xc1   : > { %v2520_v60 = vmax.f32 %v541_v47, 0.0 }
  0xc2   : > { %v486_v17 = vadd.f32 %v485_v0, %v480_v49  ;;  %v496_v18 = vadd.f32 %v495_v16, %v481_v63 }
  0xc4   : > { %v2495_v19 = vpop.permute.xlu2 %627  ;;  %v487_v20 = vadd.f32 %v486_v17, %v482_v51  ;;  %v497_v23 = vadd.f32 %v496_v18, %v483_v52  ;;  %v522_v27 = vpop.permute.xlu1 %521  ;;  %987 = vperm.xlu2 %2016, %v2347_v10   ;;  %v544_v52 = vsub.f32 %v2444_v38, %v2478_v53  ;;  %v545_v17 = vsub.f32 %v2447_v39, %v2478_v53 }
  0xc5   : > { %v518_v24 = vpop.permute.xlu0 %517  ;;  %983 = vperm.xlu1 %2018, %v2352_v11   ;;  %v538_v61 = vsub.f32 %v2425_v29, %v522_v27  ;;  %v539_v62 = vsub.f32 %v2428_v30, %v522_v27  ;;  %v590_v18 = vsub.f32 %v2487_v55, %v2460_v57 }
  0xc6   : > { %v488_v28 = vrot.slane %v487_v20, 4  ;;  %v498_v31 = vrot.slane %v497_v23, 4  ;;  %1101 = vperm.xlu0 %2019, %v2311_v4   ;;  %v536_v43 = vsub.f32 %v2417_v25, %v518_v24  ;;  %v537_v22 = vsub.f32 %v2420_v26, %v518_v24 }
  0xc7   : > { %v548_v16 = vmax.f32 %v538_v61, 0.0  ;;  %v549_v51 = vmax.f32 %v539_v62, 0.0 }
  0xc8   : > { %v489_v12 = vadd.f32 %v488_v28, %v487_v20  ;;  %v499_v9 = vadd.f32 %v498_v31, %v497_v23  ;;  %v546_v20 = vmax.f32 %v536_v43, 0.0  ;;  %v547_v27 = vmax.f32 %v537_v22, 0.0 }
  0xca   : > { %v490_v32 = vrot.slane %v489_v12, 2  ;;  %v500_v33 = vrot.slane %v499_v9, 2  ;;  %v557_v61 = vmin.f32 %v547_v27, 1.0 }
  0xcc   : > { %v2500_v34 = vpop.permute.xlu2 %639  ;;  %v491_v21 = vadd.f32 %v490_v32, %v489_v12  ;;  %v501_v35 = vadd.f32 %v500_v33, %v499_v9  ;;  %v2502_v40 = vpop.permute.xlu1 %529  ;;  %999 = vperm.xlu2 %2016, %v2365_v13  }
  0xcd   : > { %v568_v45 = vpop.permute.xlu0 %567  ;;  %995 = vperm.xlu1 %2018, %v2370_v14   ;;  %v542_v47 = vsub.f32 %v2438_v36, %v2502_v40 }
  0xce   : > { %v492_v41 = vrot.slane %v491_v21, 1  ;;  %v502_v42 = vrot.slane %v501_v35, 1  ;;  %1113 = vperm.xlu0 %2019, %v2329_v7   ;;  %v586_v54 = vsub.f32 %v568_v45, %v2417_v25  ;;  %v587_v56 = vsub.f32 %v568_v45, %v2420_v26 }
  0xcf   : > { %v559_v45 = vmin.f32 %v549_v51, 1.0  ;;  %v552_v51 = vmax.f32 %v542_v47, 0.0 }
  0xd0   : > { %v503_v44 = vadd.f32 %v502_v42, %v501_v35  ;;  %v493_v63 = vadd.f32 %v492_v41, %v491_v21  ;;  %v596_v24 = vmax.f32 %v586_v54, 0.0  ;;  %v597_v28 = vmax.f32 %v587_v56, 0.0 }
  0xd1   : > { %v591_v21 = vsub.f32 %v2487_v55, %v2463_v58  ;;  %v558_v35 = vmin.f32 %v548_v16, 1.0  ;;  %v556_v42 = vmin.f32 %v546_v20, 1.0  ;;  %v560_v56 = vmin.f32 %v2518_v59, 1.0 }
  0xd2   : > { %v506_v0 = vrot.slane %v503_v44, 7  ;;  %v606_v62 = vmin.f32 %v596_v24, 1.0  ;;  %v607_v55 = vmin.f32 %v597_v28, 1.0 }
  0xd3   : > { %v601_v16 = vmax.f32 %v591_v21, 0.0 }
  0xd4   : > { %v508_v23 = vsel %vm507_vm0, %v493_v63, %v506_v0  ;;  %v572_v31 = vpop.permute.xlu1 %571  ;;  %2021 = vset.pattern.permute.xlu2 %v2177_v48  ;;  %v561_v63 = vmin.f32 %v2520_v60, 1.0  ;;  %v600_v0 = vmax.f32 %v590_v18, 0.0  ;;  %v616_v20 = vmul.f32 %v606_v62, %v556_v42 }
  0xd5   : > { %v580_v12 = vpop.permute.xlu0 %579  ;;  %514 = vst.msk [vmem:[%s2534_s10] ss:$8 sm:$0x3] %vm2522_vm1, %v508_v23  ;;  %v588_v53 = vsub.f32 %v572_v31, %v2425_v29  ;;  %v589_v9 = vsub.f32 %v572_v31, %v2428_v30  ;;  %2020 = vset.pattern.permute.xlu1 %v2177_v48  ;;  %v2543_v33 = vpop.permute.xlu2 %699  ;;  %1059 = vperm.xlu2 %2021, %v2298_v2   ;;  %v611_v18 = vmin.f32 %v601_v16, 1.0 }
  0xd6   : > { %v592_v32 = vsub.f32 %v580_v12, %v2438_v36  ;;  %v593_v46 = vsub.f32 %v580_v12, %v2441_v37  ;;  %1055 = vperm.xlu1 %2020, %v2321_v6   ;;  %v543_v48 = vsub.f32 %v2441_v37, %v2502_v40  ;;  %1165 = vperm.xlu0 %2019, %v2347_v10   ;;  %v554_v12 = vmax.f32 %v544_v52, 0.0 }
  0xd7   : > { %v598_v50 = vmax.f32 %v588_v53, 0.0  ;;  %v599_v41 = vmax.f32 %v589_v9, 0.0  ;;  %v555_v53 = vmax.f32 %v545_v17, 0.0  ;;  %v617_v27 = vmul.f32 %v607_v55, %v557_v61 }
  0xd8   : > { %v602_v22 = vmax.f32 %v592_v32, 0.0  ;;  %v603_v54 = vmax.f32 %v593_v46, 0.0  ;;  %v553_v40 = vmax.f32 %v543_v48, 0.0  ;;  %v610_v60 = vmin.f32 %v600_v0, 1.0 }
  0xd9   : > { %v608_v43 = vmin.f32 %v598_v50, 1.0  ;;  %v609_v44 = vmin.f32 %v599_v41, 1.0  ;;  %v562_v52 = vmin.f32 %v552_v51, 1.0  ;;  %v564_v48 = vmin.f32 %v554_v12, 1.0 }
  0xda   : > { %v612_v9 = vmin.f32 %v602_v22, 1.0  ;;  %v613_v50 = vmin.f32 %v603_v54, 1.0  ;;  %v563_v17 = vmin.f32 %v553_v40, 1.0  ;;  %v565_v41 = vmin.f32 %v555_v53, 1.0 }
  0xdb   : > { %v618_v23 = vmul.f32 %v608_v43, %v558_v35  ;;  %v619_v31 = vmul.f32 %v609_v44, %v559_v45  ;;  %v646_v42 = vmul.f32 %v2495_v19, %v616_v20  ;;  %v647_v61 = vmul.f32 %v2495_v19, %v617_v27 }
  0xdc   : > { %v584_v24 = vpop.permute.xlu1 %583  ;;  %v622_v62 = vmul.f32 %v612_v9, %v562_v52  ;;  %v623_v55 = vmul.f32 %v613_v50, %v563_v17  ;;  %v620_v0 = vmul.f32 %v610_v60, %v560_v56  ;;  %v621_v16 = vmul.f32 %v611_v18, %v561_v63  ;;  %v3025_v56 = vld [vmem:[#allocation8_spill] sm:$0xff] }
  0xdd   : > { %v632_v28 = vpop.permute.xlu0 %631  ;;  %v594_v32 = vsub.f32 %v584_v24, %v2444_v38  ;;  %v595_v59 = vsub.f32 %v584_v24, %v2447_v39  ;;  %v2559_v46 = vpop.permute.xlu2 %711  ;;  %1067 = vperm.xlu2 %2021, %v2293_v1   ;;  %v2178_v60 = vmov 5  }
  0xde   : > { %v648_v21 = vmul.f32 %v632_v28, %v618_v23  ;;  %v649_v35 = vmul.f32 %v632_v28, %v619_v31  ;;  %1063 = vperm.xlu1 %2020, %v2316_v5   ;;  %1177 = vperm.xlu0 %2019, %v2365_v13   ;;  %v656_v23 = vmul.f32 %v646_v42, %v646_v42 }
  0xdf   : > { %v604_v45 = vmax.f32 %v594_v32, 0.0  ;;  %v605_v47 = vmax.f32 %v595_v59, 0.0  ;;  %v657_v31 = vmul.f32 %v647_v61, %v647_v61  ;;  %v652_v12 = vmul.f32 %v2500_v34, %v622_v62  ;;  %v3026_v62 = vld [vmem:[#allocation9_spill] sm:$0xff] }
  0xe0   : > { %v658_v22 = vmul.f32 %v648_v21, %v648_v21  ;;  %v659_v54 = vmul.f32 %v649_v35, %v649_v35  ;;  %v653_v53 = vmul.f32 %v2500_v34, %v623_v55 }
  0xe1   : > { %v614_v43 = vmin.f32 %v604_v45, 1.0  ;;  %v615_v44 = vmin.f32 %v605_v47, 1.0  ;;  %v662_v18 = vmul.f32 %v652_v12, %v652_v12 }
  0xe2   : > { %v666_v28 = vadd.f32 %v658_v22, %v656_v23  ;;  %v676_v9 = vadd.f32 %v659_v54, %v657_v31  ;;  %v663_v34 = vmul.f32 %v653_v53, %v653_v53  ;;  %v716_v31 = vsub.f32 %v2425_v29, %v2543_v33 }
  0xe3   : > { %v624_v51 = vmul.f32 %v614_v43, %v564_v48  ;;  %v625_v40 = vmul.f32 %v615_v44, %v565_v41 }
  0xe4   : > { %v636_v24 = vpop.permute.xlu1 %635 }
  0xe5   : > { %v644_v13 = vpop.permute.xlu0 %643  ;;  %v650_v20 = vmul.f32 %v636_v24, %v620_v0  ;;  %v651_v19 = vmul.f32 %v636_v24, %v621_v16  ;;  %v2568_v27 = vpop.permute.xlu2 %749  ;;  %1109 = vperm.xlu2 %2021, %v2334_v8  }
  0xe6   : > { %1105 = vperm.xlu1 %2020, %v3025_v56   ;;  %v654_v32 = vmul.f32 %v644_v13, %v624_v51  ;;  %v655_v59 = vmul.f32 %v644_v13, %v625_v40  ;;  %2024 = vset.pattern.permute.xlu0 %v2178_v60 }
  0xe7   : > { %v660_v63 = vmul.f32 %v650_v20, %v650_v20  ;;  %v661_v50 = vmul.f32 %v651_v19, %v651_v19  ;;  %1237 = vperm.xlu0 %2024, %v2298_v2   ;;  %v2589_v20 = vmax.f32 %v716_v31, 0.0 }
  0xe8   : > { %v664_v52 = vmul.f32 %v654_v32, %v654_v32  ;;  %v665_v17 = vmul.f32 %v655_v59, %v655_v59 }
  0xe9   : > { %v667_v21 = vadd.f32 %v666_v28, %v660_v63  ;;  %v677_v35 = vadd.f32 %v676_v9, %v661_v50  ;;  %v766_v9 = vsub.f32 %v2568_v27, %v2425_v29  ;;  %v767_v50 = vsub.f32 %v2568_v27, %v2428_v30 }
  0xeb   : > { %v668_v45 = vadd.f32 %v667_v21, %v662_v18  ;;  %v678_v47 = vadd.f32 %v677_v35, %v663_v34 }
  0xed   : > { %v669_v48 = vadd.f32 %v668_v45, %v664_v52  ;;  %v679_v41 = vadd.f32 %v678_v47, %v665_v17  ;;  %v2573_v42 = vpop.permute.xlu2 %761  ;;  %1161 = vperm.xlu2 %2021, %v2352_v11   ;;  %v776_v45 = vmax.f32 %v766_v9, 0.0  ;;  %v777_v47 = vmax.f32 %v767_v50, 0.0 }
  0xee   : > { %v696_v61 = vpop.permute.xlu1 %695  ;;  %1117 = vperm.xlu1 %2020, %v3026_v62   ;;  %v704_v2 = vpop.permute.xlu0 %703 }
  0xef   : > { %v670_v55 = vrot.slane %v669_v48, 4  ;;  %v680_v43 = vrot.slane %v679_v41, 4  ;;  %1287 = vperm.xlu0 %2024, %v2334_v8   ;;  %v717_v8 = vsub.f32 %v2428_v30, %v2543_v33  ;;  %v714_v32 = vsub.f32 %v2417_v25, %v696_v61 }
  0xf0   : > { %v718_v33 = vsub.f32 %v2460_v57, %v704_v2  ;;  %v719_v59 = vsub.f32 %v2463_v58, %v704_v2  ;;  %v715_v35 = vsub.f32 %v2420_v26, %v696_v61  ;;  %v736_v61 = vmin.f32 %v2589_v20, 1.0 }
  0xf1   : > { %v671_v44 = vadd.f32 %v670_v55, %v669_v48  ;;  %v681_v22 = vadd.f32 %v680_v43, %v679_v41  ;;  %v2593_v63 = vmax.f32 %v717_v8, 0.0  ;;  %v787_v31 = vmin.f32 %v777_v47, 1.0 }
  0xf2   : > { %v728_v48 = vmax.f32 %v718_v33, 0.0  ;;  %v773_v33 = vsub.f32 %v2573_v42, %v2447_v39 }
  0xf3   : > { %v672_v54 = vrot.slane %v671_v44, 2  ;;  %v682_v0 = vrot.slane %v681_v22, 2 }
  0xf5   : > { %v673_v16 = vadd.f32 %v672_v54, %v671_v44  ;;  %v683_v51 = vadd.f32 %v682_v0, %v681_v22  ;;  %v2578_v40 = vpop.permute.xlu2 %813  ;;  %1173 = vperm.xlu2 %2021, %v2370_v14   ;;  %v737_v44 = vmin.f32 %v2593_v63, 1.0  ;;  %v722_v22 = vsub.f32 %v2444_v38, %v2559_v46 }
  0xf6   : > { %v2581_v23 = vpop.permute.xlu1 %707  ;;  %1169 = vperm.xlu1 %2020, %v2375_v15   ;;  %v754_v53 = vpop.permute.xlu0 %753  ;;  %v724_v54 = vmax.f32 %v714_v32, 0.0  ;;  %v725_v0 = vmax.f32 %v715_v35, 0.0 }
  0xf7   : > { %v674_v24 = vrot.slane %v673_v16, 1  ;;  %v684_v13 = vrot.slane %v683_v51, 1  ;;  %1339 = vperm.xlu0 %2024, %v2352_v11   ;;  %v768_v18 = vsub.f32 %v754_v53, %v2460_v57  ;;  %v769_v34 = vsub.f32 %v754_v53, %v2463_v58 }
  0xf8   : > { %v734_v9 = vmin.f32 %v724_v54, 1.0  ;;  %v735_v63 = vmin.f32 %v725_v0, 1.0 }
  0xf9   : > { %v685_v12 = vadd.f32 %v684_v13, %v683_v51  ;;  %v675_v19 = vadd.f32 %v674_v24, %v673_v16  ;;  %v778_v43 = vmax.f32 %v768_v18, 0.0  ;;  %v779_v2 = vmax.f32 %v769_v34, 0.0 }
  0xfa   : > { %v786_v16 = vmin.f32 %v776_v45, 1.0  ;;  %v720_v51 = vsub.f32 %v2438_v36, %v2581_v23  ;;  %v738_v24 = vmin.f32 %v728_v48, 1.0  ;;  %v732_v45 = vmax.f32 %v722_v22, 0.0 }
  0xfb   : > { %v688_v28 = vrot.slane %v685_v12, 7  ;;  %v788_v20 = vmin.f32 %v778_v43, 1.0  ;;  %v797_v43 = vmul.f32 %v787_v31, %v737_v44 }
  0xfd   : > { %v689_v11 = vsel %vm507_vm0, %v675_v19, %v688_v28  ;;  %2023 = vset.pattern.permute.xlu2 %v2178_v60  ;;  %v789_v19 = vmin.f32 %v779_v2, 1.0 }
  0xfe   : > { %v746_v21 = vpop.permute.xlu1 %745  ;;  %1918 = vst.msk [vmem:[%s2534_s10 + $0x1] ss:$8 sm:$0x3] %vm2522_vm1, %v689_v11  ;;  %2022 = vset.pattern.permute.xlu1 %v2178_v60  ;;  %1233 = vperm.xlu2 %2023, %v2321_v6   ;;  %v2610_v17 = vpop.permute.xlu2 %873  ;;  %v729_v60 = vmax.f32 %v719_v59, 0.0  ;;  %v730_v11 = vmax.f32 %v720_v51, 0.0 }
  0xff   : > { %v764_v27 = vsub.f32 %v746_v21, %v2417_v25  ;;  %v765_v52 = vsub.f32 %v746_v21, %v2420_v26  ;;  %1229 = vperm.xlu1 %2022, %v2303_v3   ;;  %1351 = vperm.xlu0 %2024, %v2370_v14   ;;  %v723_v3 = vsub.f32 %v2447_v39, %v2559_v46  ;;  %v806_v12 = vpop.permute.xlu0 %805 }
 0x100   : > { %v721_v14 = vsub.f32 %v2441_v37, %v2581_v23  ;;  %v739_v53 = vmin.f32 %v729_v60, 1.0  ;;  %v772_v23 = vsub.f32 %v2573_v42, %v2444_v38  ;;  %v796_v60 = vmul.f32 %v786_v16, %v736_v61 }
 0x101   : > { %v774_v41 = vmax.f32 %v764_v27, 0.0  ;;  %v775_v55 = vmax.f32 %v765_v52, 0.0  ;;  %v2179_v27 = vmov 6   ;;  %v733_v47 = vmax.f32 %v723_v3, 0.0 }
 0x102   : > { %v731_v59 = vmax.f32 %v721_v14, 0.0  ;;  %v799_v52 = vmul.f32 %v789_v19, %v739_v53  ;;  %v782_v42 = vmax.f32 %v772_v23, 0.0  ;;  %v742_v61 = vmin.f32 %v732_v45, 1.0 }
 0x103   : > { %v784_v13 = vmin.f32 %v774_v41, 1.0  ;;  %v785_v8 = vmin.f32 %v775_v55, 1.0  ;;  %v783_v55 = vmax.f32 %v773_v33, 0.0  ;;  %v743_v44 = vmin.f32 %v733_v47, 1.0 }
 0x104   : > { %v741_v2 = vmin.f32 %v731_v59, 1.0  ;;  %v829_v14 = vmul.f32 %v2578_v40, %v799_v52  ;;  %v792_v16 = vmin.f32 %v782_v42, 1.0 }
 0x105   : > { %v794_v18 = vmul.f32 %v784_v13, %v734_v9  ;;  %v795_v34 = vmul.f32 %v785_v8, %v735_v63  ;;  %v793_v31 = vmin.f32 %v783_v55, 1.0 }
 0x106   : > { %v758_v28 = vpop.permute.xlu1 %757  ;;  %1245 = vperm.xlu2 %2023, %v2293_v1   ;;  %v2627_v32 = vpop.permute.xlu2 %885  ;;  %v798_v1 = vmul.f32 %v788_v20, %v738_v24  ;;  %v839_v9 = vmul.f32 %v829_v14, %v829_v14  ;;  %v802_v59 = vmul.f32 %v792_v16, %v742_v61  ;;  %v893_v16 = vsub.f32 %v2420_v26, %v2610_v17 }
 0x107   : > { %v770_v46 = vsub.f32 %v758_v28, %v2438_v36  ;;  %v771_v50 = vsub.f32 %v758_v28, %v2441_v37  ;;  %1241 = vperm.xlu1 %2022, %v2316_v5   ;;  %2026 = vset.pattern.permute.xlu0 %v2179_v27  ;;  %v740_v5 = vmin.f32 %v730_v11, 1.0  ;;  %v824_v54 = vmul.f32 %v806_v12, %v794_v18  ;;  %v818_v13 = vpop.permute.xlu0 %817 }
 0x108   : > { %1411 = vperm.xlu0 %2026, %v2321_v6   ;;  %v825_v0 = vmul.f32 %v806_v12, %v795_v34  ;;  %v828_v51 = vmul.f32 %v2578_v40, %v798_v1  ;;  %v803_v18 = vmul.f32 %v793_v31, %v743_v44 }
 0x109   : > { %v780_v21 = vmax.f32 %v770_v46, 0.0  ;;  %v781_v35 = vmax.f32 %v771_v50, 0.0  ;;  %v834_v12 = vmul.f32 %v824_v54, %v824_v54 }
 0x10a   : > { %v835_v20 = vmul.f32 %v825_v0, %v825_v0  ;;  %v838_v28 = vmul.f32 %v828_v51, %v828_v51 }
 0x10b   : > { %v790_v48 = vmin.f32 %v780_v21, 1.0  ;;  %v791_v41 = vmin.f32 %v781_v35, 1.0 }
 0x10d   : > { %v800_v8 = vmul.f32 %v790_v48, %v740_v5  ;;  %v801_v6 = vmul.f32 %v791_v41, %v741_v2 }
 0x10e   : > { %v810_v24 = vpop.permute.xlu1 %809  ;;  %1283 = vperm.xlu2 %2023, %v3025_v56   ;;  %v2639_v53 = vpop.permute.xlu2 %923 }
 0x10f   : > { %v826_v22 = vmul.f32 %v810_v24, %v796_v60  ;;  %v827_v3 = vmul.f32 %v810_v24, %v797_v43  ;;  %1279 = vperm.xlu1 %2022, %v2311_v4   ;;  %v830_v63 = vmul.f32 %v818_v13, %v800_v8  ;;  %v831_v46 = vmul.f32 %v818_v13, %v801_v6 }
 0x110   : > { %1461 = vperm.xlu0 %2026, %v3025_v56   ;;  %v878_v56 = vpop.permute.xlu0 %877  ;;  %v892_v13 = vsub.f32 %v2417_v25, %v2610_v17  ;;  %v943_v17 = vsub.f32 %v2639_v53, %v2420_v26  ;;  %v898_v26 = vsub.f32 %v2438_v36, %v2627_v32 }
 0x111   : > { %v836_v19 = vmul.f32 %v826_v22, %v826_v22  ;;  %v837_v40 = vmul.f32 %v827_v3, %v827_v3  ;;  %v840_v21 = vmul.f32 %v830_v63, %v830_v63  ;;  %v841_v35 = vmul.f32 %v831_v46, %v831_v46 }
 0x112   : > { %v894_v22 = vsub.f32 %v2425_v29, %v878_v56  ;;  %v895_v3 = vsub.f32 %v2428_v30, %v878_v56  ;;  %v2666_v31 = vmax.f32 %v892_v13, 0.0 }
 0x113   : > { %v844_v50 = vadd.f32 %v836_v19, %v834_v12  ;;  %v854_v23 = vadd.f32 %v837_v40, %v835_v20  ;;  %v2671_v12 = vld [vmem:[%s3011_s3 + $0x20] sm:$0xff]  ;;  %v942_v20 = vsub.f32 %v2639_v53, %v2417_v25 }
 0x115   : > { %v845_v33 = vadd.f32 %v844_v50, %v838_v28  ;;  %v855_v11 = vadd.f32 %v854_v23, %v839_v9  ;;  %v904_v28 = vmax.f32 %v894_v22, 0.0  ;;  %v905_v9 = vmax.f32 %v895_v3, 0.0 }
 0x116   : > { %v822_v34 = vpop.permute.xlu1 %821  ;;  %1295 = vperm.xlu2 %2023, %v3026_v62   ;;  %v2644_v52 = vpop.permute.xlu2 %935  ;;  %v2180_v50 = vmov 7   ;;  %v952_v53 = vmax.f32 %v942_v20, 0.0  ;;  %v908_v3 = vmax.f32 %v898_v26, 0.0 }
 0x117   : > { %v832_v4 = vmul.f32 %v822_v34, %v802_v59  ;;  %v833_v1 = vmul.f32 %v822_v34, %v803_v18  ;;  %1291 = vperm.xlu1 %2022, %v2329_v7   ;;  %v846_v48 = vadd.f32 %v845_v33, %v840_v21  ;;  %v856_v41 = vadd.f32 %v855_v11, %v841_v35 }
 0x118   : > { %1473 = vperm.xlu0 %2026, %v3026_v62   ;;  %v928_v24 = vpop.permute.xlu0 %927  ;;  %v903_v33 = vmax.f32 %v893_v16, 0.0  ;;  %v912_v11 = vmin.f32 %v2666_v31, 1.0  ;;  %v953_v59 = vmax.f32 %v943_v17, 0.0  ;;  %v914_v18 = vmin.f32 %v904_v28, 1.0 }
 0x119   : > { %v842_v45 = vmul.f32 %v832_v4, %v832_v4  ;;  %v843_v47 = vmul.f32 %v833_v1, %v833_v1  ;;  %v945_v61 = vsub.f32 %v928_v24, %v2428_v30  ;;  %v2032_v30 = vld [vmem:[%s3009_s1] sm:$0xff]  ;;  %v915_v34 = vmin.f32 %v905_v9, 1.0 }
 0x11a   : > { %v899_v4 = vsub.f32 %v2441_v37, %v2627_v32  ;;  %v2703_v32 = vld [vmem:[%s3009_s1 + $0x18] sm:$0xff]  ;;  %v918_v26 = vmin.f32 %v908_v3, 1.0 }
 0x11b   : > { %v847_v42 = vadd.f32 %v846_v48, %v842_v45  ;;  %v857_v55 = vadd.f32 %v856_v41, %v843_v47  ;;  %v955_v46 = vmax.f32 %v945_v61, 0.0  ;;  %v913_v47 = vmin.f32 %v903_v33, 1.0 }
 0x11d   : > { %v848_v60 = vrot.slane %v847_v42, 4  ;;  %v858_v43 = vrot.slane %v857_v55, 4  ;;  %v965_v35 = vmin.f32 %v955_v46, 1.0 }
 0x11e   : > { %1347 = vperm.xlu2 %2023, %v2375_v15   ;;  %v2649_v54 = vpop.permute.xlu2 %987 }
 0x11f   : > { %v849_v5 = vadd.f32 %v848_v60, %v847_v42  ;;  %v859_v2 = vadd.f32 %v858_v43, %v857_v55  ;;  %1343 = vperm.xlu1 %2022, %v2347_v10   ;;  %v2652_v7 = vpop.permute.xlu1 %881  ;;  %v944_v10 = vsub.f32 %v928_v24, %v2425_v29  ;;  %v962_v43 = vmin.f32 %v952_v53, 1.0 }
 0x120   : > { %1525 = vperm.xlu0 %2026, %v2375_v15   ;;  %v940_v25 = vpop.permute.xlu0 %939  ;;  %v896_v1 = vsub.f32 %v2460_v57, %v2652_v7  ;;  %v897_v56 = vsub.f32 %v2463_v58, %v2652_v7  ;;  %v949_v7 = vsub.f32 %v2644_v52, %v2441_v37 }
 0x121   : > { %v850_v0 = vrot.slane %v849_v5, 2  ;;  %v860_v51 = vrot.slane %v859_v2, 2  ;;  %v954_v63 = vmax.f32 %v944_v10, 0.0  ;;  %v950_v45 = vsub.f32 %v940_v25, %v2444_v38 }
 0x122   : > { %v951_v42 = vsub.f32 %v940_v25, %v2447_v39 }
 0x123   : > { %v851_v14 = vadd.f32 %v850_v0, %v849_v5  ;;  %v861_v62 = vadd.f32 %v860_v51, %v859_v2  ;;  %v964_v21 = vmin.f32 %v954_v63, 1.0  ;;  %v963_v5 = vmin.f32 %v953_v59, 1.0  ;;  %v2728_v63 = vld [vmem:[%s3010_s2] sm:$0xff] }
 0x124   : > { %v975_v51 = vmul.f32 %v965_v35, %v915_v34  ;;  %v961_v22 = vmax.f32 %v951_v42, 0.0 }
 0x125   : > { %v852_v8 = vrot.slane %v851_v14, 1  ;;  %v862_v6 = vrot.slane %v861_v62, 1  ;;  %v974_v0 = vmul.f32 %v964_v21, %v914_v18  ;;  %v973_v16 = vmul.f32 %v963_v5, %v913_v47 }
 0x126   : > { %2025 = vset.pattern.permute.xlu2 %v2179_v27  ;;  %v2662_v15 = vpop.permute.xlu2 %999  ;;  %v971_v28 = vmin.f32 %v961_v22, 1.0 }
 0x127   : > { %v863_v44 = vadd.f32 %v862_v6, %v861_v62  ;;  %1355 = vperm.xlu1 %2022, %v2671_v12   ;;  %v890_v29 = vpop.permute.xlu1 %889  ;;  %1407 = vperm.xlu2 %2025, %v2032_v30   ;;  %v853_v19 = vadd.f32 %v852_v8, %v851_v14  ;;  %v906_v14 = vmax.f32 %v896_v1, 0.0  ;;  %v907_v62 = vmax.f32 %v897_v56, 0.0 }
 0x128   : > { %2028 = vset.pattern.permute.xlu0 %v2180_v50  ;;  %v900_v48 = vsub.f32 %v2444_v38, %v890_v29  ;;  %v901_v41 = vsub.f32 %v2447_v39, %v890_v29  ;;  %v2713_v39 = vld [vmem:[%s3009_s1 + $0x10] sm:$0xff]  ;;  %v960_v6 = vmax.f32 %v950_v45, 0.0  ;;  %v1004_v31 = vmul.f32 %v2649_v54, %v974_v0  ;;  %v992_v59 = vpop.permute.xlu0 %991 }
 0x129   : > { %v866_v40 = vrot.slane %v863_v44, 7  ;;  %1585 = vperm.xlu0 %2028, %v2032_v30   ;;  %v972_v44 = vmul.f32 %v962_v43, %v912_v11  ;;  %v1005_v29 = vmul.f32 %v2649_v54, %v975_v51  ;;  %v916_v30 = vmin.f32 %v906_v14, 1.0  ;;  %v2037_v11 = vld [vmem:[%s3009_s1 + $0x20] sm:$0xff] }
 0x12a   : > { %v910_v13 = vmax.f32 %v900_v48, 0.0  ;;  %v911_v8 = vmax.f32 %v901_v41, 0.0  ;;  %v917_v20 = vmin.f32 %v907_v62, 1.0  ;;  %v1014_v56 = vmul.f32 %v1004_v31, %v1004_v31 }
 0x12b   : > { %v867_v23 = vsel %vm507_vm0, %v853_v19, %v866_v40  ;;  %v970_v40 = vmin.f32 %v960_v6, 1.0  ;;  %v1015_v45 = vmul.f32 %v1005_v29, %v1005_v29 }
 0x12c   : > { %1919 = vst.msk [vmem:[%s2534_s10 + $0x2] ss:$8 sm:$0x3] %vm2522_vm1, %v867_v23  ;;  %v920_v17 = vmin.f32 %v910_v13, 1.0  ;;  %v921_v19 = vmin.f32 %v911_v8, 1.0 }
 0x12e   : > { %v981_v1 = vmul.f32 %v971_v28, %v921_v19 }
 0x12f   : > { %2027 = vset.pattern.permute.xlu1 %v2179_v27  ;;  %v932_v55 = vpop.permute.xlu1 %931  ;;  %1419 = vperm.xlu2 %2025, %v2703_v32   ;;  %v2706_v60 = vpop.permute.xlu2 %1059  ;;  %v948_v27 = vsub.f32 %v2644_v52, %v2438_v36  ;;  %v909_v36 = vmax.f32 %v899_v4, 0.0  ;;  %v959_v52 = vmax.f32 %v949_v7, 0.0  ;;  %v980_v4 = vmul.f32 %v970_v40, %v920_v17 }
 0x130   : > { %v946_v38 = vsub.f32 %v932_v55, %v2460_v57  ;;  %v947_v2 = vsub.f32 %v932_v55, %v2463_v58  ;;  %1415 = vperm.xlu1 %2027, %v2713_v39   ;;  %v2035_v58 = vld [vmem:[%s3010_s2 + $0x10] sm:$0xff]  ;;  %v1052_v6 = vpop.permute.xlu0 %1051 }
 0x131   : > { %1643 = vperm.xlu0 %2028, %v2035_v58   ;;  %v958_v37 = vmax.f32 %v948_v27, 0.0  ;;  %v919_v53 = vmin.f32 %v909_v36, 1.0  ;;  %v969_v34 = vmin.f32 %v959_v52, 1.0  ;;  %v1010_v5 = vmul.f32 %v2662_v15, %v980_v4  ;;  %v2741_v27 = vld [vmem:[%s3010_s2 + $0x18] sm:$0xff] }
 0x132   : > { %v956_v57 = vmax.f32 %v946_v38, 0.0  ;;  %v957_v24 = vmax.f32 %v947_v2, 0.0  ;;  %v1011_v38 = vmul.f32 %v2662_v15, %v981_v1  ;;  %v2039_v15 = vld [vmem:[%s3011_s3 + $0x8] sm:$0xff] }
 0x133   : > { %v968_v18 = vmin.f32 %v958_v37, 1.0  ;;  %v979_v43 = vmul.f32 %v969_v34, %v919_v53  ;;  %v1020_v22 = vmul.f32 %v1010_v5, %v1010_v5  ;;  %v2772_v53 = vld [vmem:[%s3011_s3 + $0x18] sm:$0xff]  ;;  %v2791_v5 = vld [vmem:[%s2284_s7 + $0x20] sm:$0xff] }
 0x134   : > { %v966_v10 = vmin.f32 %v956_v57, 1.0  ;;  %v967_v61 = vmin.f32 %v957_v24, 1.0  ;;  %v1021_v3 = vmul.f32 %v1011_v38, %v1011_v38  ;;  %v1074_v38 = vsub.f32 %v2791_v5, %v2706_v60 }
 0x135   : > { %v978_v55 = vmul.f32 %v968_v18, %v918_v26 }
 0x136   : > { %v976_v23 = vmul.f32 %v966_v10, %v916_v30  ;;  %v977_v33 = vmul.f32 %v967_v61, %v917_v20 }
 0x137   : > { %v984_v9 = vpop.permute.xlu1 %983  ;;  %1457 = vperm.xlu2 %2025, %v2728_v63   ;;  %v2731_v46 = vpop.permute.xlu2 %1067 }
 0x138   : > { %v1002_v25 = vmul.f32 %v984_v9, %v972_v44  ;;  %v1003_v54 = vmul.f32 %v984_v9, %v973_v16  ;;  %1423 = vperm.xlu1 %2027, %v2037_v11   ;;  %v1006_v47 = vmul.f32 %v992_v59, %v976_v23  ;;  %v1007_v48 = vmul.f32 %v992_v59, %v977_v33  ;;  %v2754_v16 = vld [vmem:[%s3011_s3] sm:$0xff]  ;;  %v1102_v19 = vpop.permute.xlu0 %1101  ;;  %v2763_v33 = vld [vmem:[%s2284_s7 + $0x8] sm:$0xff] }
 0x139   : > { %1601 = vperm.xlu0 %2028, %v2037_v11   ;;  %v2759_v9 = vld [vmem:[%s2284_s7] sm:$0xff] }
 0x13a   : > { %v1012_v21 = vmul.f32 %v1002_v25, %v1002_v25  ;;  %v1013_v35 = vmul.f32 %v1003_v54, %v1003_v54  ;;  %v1016_v0 = vmul.f32 %v1006_v47, %v1006_v47  ;;  %v1017_v51 = vmul.f32 %v1007_v48, %v1007_v48  ;;  %v2786_v47 = vld [vmem:[%s2284_s7 + $0x18] sm:$0xff] }
 0x13b   : > { %v1070_v23 = vsub.f32 %v2759_v9, %v1052_v6  ;;  %v1071_v25 = vsub.f32 %v2763_v33, %v1052_v6  ;;  %v1120_v34 = vsub.f32 %v1102_v19, %v2759_v9 }
 0x13c   : > { %v1022_v41 = vadd.f32 %v1014_v56, %v1012_v21  ;;  %v1032_v42 = vadd.f32 %v1015_v45, %v1013_v35  ;;  %v2782_v56 = vld [vmem:[%s2284_s7 + $0x10] sm:$0xff] }
 0x13d   : > { %v2777_v21 = vmax.f32 %v1070_v23, 0.0  ;;  %v2779_v35 = vmax.f32 %v1071_v25, 0.0 }
 0x13e   : > { %v1023_v13 = vadd.f32 %v1022_v41, %v1016_v0  ;;  %v1033_v8 = vadd.f32 %v1032_v42, %v1017_v51 }
 0x13f   : > { %v996_v2 = vpop.permute.xlu1 %995  ;;  %1469 = vperm.xlu2 %2025, %v2741_v27   ;;  %v2744_v7 = vpop.permute.xlu2 %1109  ;;  %v1090_v51 = vmin.f32 %v2777_v21, 1.0 }
 0x140   : > { %v1008_v14 = vmul.f32 %v996_v2, %v978_v55  ;;  %v1009_v62 = vmul.f32 %v996_v2, %v979_v43  ;;  %1465 = vperm.xlu1 %2027, %v2035_v58   ;;  %v1114_v41 = vpop.permute.xlu0 %1113  ;;  %v1130_v55 = vmax.f32 %v1120_v34, 0.0  ;;  %v2796_v2 = vld [vmem:[%s2284_s7 + $0x28] sm:$0xff] }
 0x141   : > { %1699 = vperm.xlu0 %2028, %v2039_v15   ;;  %v1075_v0 = vsub.f32 %v2796_v2, %v2706_v60 }
 0x142   : > { %v1018_v57 = vmul.f32 %v1008_v14, %v1008_v14  ;;  %v1019_v24 = vmul.f32 %v1009_v62, %v1009_v62  ;;  %v1091_v14 = vmin.f32 %v2779_v35, 1.0 }
 0x144   : > { %v1024_v36 = vadd.f32 %v1023_v13, %v1018_v57  ;;  %v1034_v10 = vadd.f32 %v1033_v8, %v1019_v24  ;;  %v2807_v24 = vld [vmem:[%s2284_s7 + $0x30] sm:$0xff]  ;;  %v2811_v8 = vld [vmem:[%s2284_s7 + $0x38] sm:$0xff] }
 0x145   : > { %v1126_v13 = vsub.f32 %v1114_v41, %v2807_v24  ;;  %v1127_v60 = vsub.f32 %v1114_v41, %v2811_v8 }
 0x146   : > { %v1025_v61 = vadd.f32 %v1024_v36, %v1020_v22  ;;  %v1035_v37 = vadd.f32 %v1034_v10, %v1021_v3 }
 0x147   : > { %1521 = vperm.xlu2 %2025, %v2039_v15   ;;  %v2749_v52 = vpop.permute.xlu2 %1161  ;;  %v1137_v23 = vmax.f32 %v1127_v60, 0.0 }
 0x148   : > { %v1026_v58 = vrot.slane %v1025_v61, 4  ;;  %v1036_v44 = vrot.slane %v1035_v37, 4  ;;  %1517 = vperm.xlu1 %2027, %v2754_v16   ;;  %v1056_v31 = vpop.permute.xlu1 %1055 }
 0x149   : > { %1711 = vperm.xlu0 %2028, %v2671_v12   ;;  %v1072_v45 = vsub.f32 %v2782_v56, %v1056_v31  ;;  %v1073_v48 = vsub.f32 %v2786_v47, %v1056_v31 }
 0x14a   : > { %v1027_v29 = vadd.f32 %v1026_v58, %v1025_v61  ;;  %v1037_v30 = vadd.f32 %v1036_v44, %v1035_v37  ;;  %v2050_v61 = vld [vmem:[%s3009_s1 + $0x8] sm:$0xff]  ;;  %v2826_v37 = vld [vmem:[%s2284_s7 + $0x40] sm:$0xff]  ;;  %v1140_v44 = vmin.f32 %v1130_v55, 1.0 }
 0x14b   : > { %v1082_v62 = vmax.f32 %v1072_v45, 0.0  ;;  %v1083_v57 = vmax.f32 %v1073_v48, 0.0 }
 0x14c   : > { %v1028_v20 = vrot.slane %v1027_v29, 2  ;;  %v1038_v17 = vrot.slane %v1037_v30, 2 }
 0x14e   : > { %v1029_v40 = vadd.f32 %v1028_v20, %v1027_v29  ;;  %v1039_v28 = vadd.f32 %v1038_v17, %v1037_v30  ;;  %v1124_v29 = vsub.f32 %v2744_v7, %v2791_v5  ;;  %v1125_v30 = vsub.f32 %v2744_v7, %v2796_v2 }
 0x14f   : > { %1533 = vperm.xlu2 %2025, %v2671_v12   ;;  %v2767_v54 = vpop.permute.xlu2 %1173  ;;  %v1121_v12 = vsub.f32 %v1102_v19, %v2763_v33  ;;  %v1092_v19 = vmin.f32 %v1082_v62, 1.0  ;;  %v1150_v7 = vmul.f32 %v1140_v44, %v1090_v51 }
 0x150   : > { %v1030_v11 = vrot.slane %v1029_v40, 1  ;;  %v1040_v26 = vrot.slane %v1039_v28, 1  ;;  %1529 = vperm.xlu1 %2027, %v2772_v53   ;;  %v1064_v59 = vpop.permute.xlu1 %1063  ;;  %v1134_v21 = vmax.f32 %v1124_v29, 0.0  ;;  %v1135_v35 = vmax.f32 %v1125_v30, 0.0 }
 0x151   : > { %v1131_v43 = vmax.f32 %v1121_v12, 0.0  ;;  %v1076_v22 = vsub.f32 %v2807_v24, %v1064_v59  ;;  %v1077_v3 = vsub.f32 %v2811_v8, %v1064_v59 }
 0x152   : > { %v1041_v18 = vadd.f32 %v1040_v26, %v1039_v28  ;;  %v1031_v4 = vadd.f32 %v1030_v11, %v1029_v40  ;;  %v1093_v40 = vmin.f32 %v1083_v57, 1.0  ;;  %v1136_v28 = vmax.f32 %v1126_v13, 0.0 }
 0x153   : > { %v1141_v31 = vmin.f32 %v1131_v43, 1.0  ;;  %v1086_v25 = vmax.f32 %v1076_v22, 0.0  ;;  %v1087_v11 = vmax.f32 %v1077_v3, 0.0  ;;  %v2053_v43 = vld [vmem:[%s3010_s2 + $0x8] sm:$0xff]  ;;  %v1144_v22 = vmin.f32 %v1134_v21, 1.0 }
 0x154   : > { %v1044_v1 = vrot.slane %v1041_v18, 7  ;;  %v1084_v18 = vmax.f32 %v1074_v38, 0.0  ;;  %v1146_v41 = vmin.f32 %v1136_v28, 1.0  ;;  %v1145_v3 = vmin.f32 %v1135_v35, 1.0 }
 0x155   : > { %v1151_v48 = vmul.f32 %v1141_v31, %v1091_v14  ;;  %v1096_v38 = vmin.f32 %v1086_v25, 1.0 }
 0x156   : > { %v1045_v42 = vsel %vm507_vm0, %v1031_v4, %v1044_v1  ;;  %v1166_v4 = vpop.permute.xlu0 %1165  ;;  %v1094_v51 = vmin.f32 %v1084_v18, 1.0 }
 0x157   : > { %1920 = vst.msk [vmem:[%s2534_s10 + $0x3] ss:$8 sm:$0x3] %vm2522_vm1, %v1045_v42  ;;  %2030 = vset.pattern.permute.xlu2 %v2180_v50  ;;  %v1147_v42 = vmin.f32 %v1137_v23, 1.0  ;;  %v1181_v44 = vmul.f32 %v2749_v52, %v1151_v48  ;;  %v1156_v31 = vmul.f32 %v1146_v41, %v1096_v38 }
 0x158   : > { %2029 = vset.pattern.permute.xlu1 %v2180_v50  ;;  %v1106_v15 = vpop.permute.xlu1 %1105  ;;  %1593 = vperm.xlu2 %2030, %v2713_v39   ;;  %v2816_v6 = vpop.permute.xlu2 %1233  ;;  %v1078_v50 = vsub.f32 %v2826_v37, %v2731_v46  ;;  %v2831_v39 = vld [vmem:[%s2284_s7 + $0x48] sm:$0xff]  ;;  %v1154_v28 = vmul.f32 %v1144_v22, %v1094_v51 }
 0x159   : > { %v1122_v36 = vsub.f32 %v1106_v15, %v2782_v56  ;;  %v1123_v10 = vsub.f32 %v1106_v15, %v2786_v47  ;;  %1589 = vperm.xlu1 %2029, %v2050_v61   ;;  %v1079_v58 = vsub.f32 %v2831_v39, %v2731_v46  ;;  %v1085_v46 = vmax.f32 %v1075_v0, 0.0 }
 0x15a   : > { %v1088_v34 = vmax.f32 %v1078_v50, 0.0  ;;  %v1097_v0 = vmin.f32 %v1087_v11, 1.0  ;;  %v1191_v11 = vmul.f32 %v1181_v44, %v1181_v44 }
 0x15b   : > { %v1132_v20 = vmax.f32 %v1122_v36, 0.0  ;;  %v1133_v17 = vmax.f32 %v1123_v10, 0.0  ;;  %v1089_v12 = vmax.f32 %v1079_v58, 0.0  ;;  %v1095_v14 = vmin.f32 %v1085_v46, 1.0 }
 0x15c   : > { %v1098_v61 = vmin.f32 %v1088_v34, 1.0  ;;  %v1180_v58 = vmul.f32 %v2749_v52, %v1150_v7  ;;  %v1157_v29 = vmul.f32 %v1147_v42, %v1097_v0 }
 0x15d   : > { %v1142_v26 = vmin.f32 %v1132_v20, 1.0  ;;  %v1143_v59 = vmin.f32 %v1133_v17, 1.0  ;;  %v1099_v50 = vmin.f32 %v1089_v12, 1.0  ;;  %v1155_v23 = vmul.f32 %v1145_v3, %v1095_v14 }
 0x15e   : > { %v1190_v25 = vmul.f32 %v1180_v58, %v1180_v58  ;;  %v1187_v18 = vmul.f32 %v2767_v54, %v1157_v29  ;;  %v1178_v52 = vpop.permute.xlu0 %1177  ;;  %v1250_v29 = vsub.f32 %v2782_v56, %v2816_v6 }
 0x15f   : > { %v1152_v1 = vmul.f32 %v1142_v26, %v1092_v19  ;;  %v1153_v45 = vmul.f32 %v1143_v59, %v1093_v40  ;;  %v1186_v59 = vmul.f32 %v2767_v54, %v1156_v31 }
 0x160   : > { %v1118_v55 = vpop.permute.xlu1 %1117  ;;  %1639 = vperm.xlu2 %2030, %v2053_v43   ;;  %v2842_v62 = vpop.permute.xlu2 %1245  ;;  %v1197_v41 = vmul.f32 %v1187_v18, %v1187_v18 }
 0x161   : > { %v1128_v57 = vsub.f32 %v1118_v55, %v2826_v37  ;;  %v1129_v13 = vsub.f32 %v1118_v55, %v2831_v39  ;;  %1635 = vperm.xlu1 %2029, %v2728_v63   ;;  %v1182_v60 = vmul.f32 %v1166_v4, %v1152_v1  ;;  %v1183_v15 = vmul.f32 %v1166_v4, %v1153_v45 }
 0x162   : > { %v1196_v48 = vmul.f32 %v1186_v59, %v1186_v59 }
 0x163   : > { %v1138_v36 = vmax.f32 %v1128_v57, 0.0  ;;  %v1139_v10 = vmax.f32 %v1129_v13, 0.0  ;;  %v1192_v17 = vmul.f32 %v1182_v60, %v1182_v60  ;;  %v1193_v63 = vmul.f32 %v1183_v15, %v1183_v15 }
 0x165   : > { %v1148_v30 = vmin.f32 %v1138_v36, 1.0  ;;  %v1149_v20 = vmin.f32 %v1139_v10, 1.0  ;;  %v1200_v21 = vadd.f32 %v1192_v17, %v1190_v25  ;;  %v1210_v35 = vadd.f32 %v1193_v63, %v1191_v11 }
 0x166   : > { %v1238_v60 = vpop.permute.xlu0 %1237 }
 0x167   : > { %v1158_v19 = vmul.f32 %v1148_v30, %v1098_v61  ;;  %v1159_v40 = vmul.f32 %v1149_v20, %v1099_v50  ;;  %v2055_v50 = vld [vmem:[%s3011_s3 + $0x10] sm:$0xff]  ;;  %v1251_v30 = vsub.f32 %v2786_v47, %v2816_v6 }
 0x168   : > { %v1170_v26 = vpop.permute.xlu1 %1169  ;;  %1647 = vperm.xlu2 %2030, %v2741_v27   ;;  %v2852_v12 = vpop.permute.xlu2 %1283 }
 0x169   : > { %v1184_v46 = vmul.f32 %v1170_v26, %v1154_v28  ;;  %v1185_v34 = vmul.f32 %v1170_v26, %v1155_v23  ;;  %1597 = vperm.xlu1 %2029, %v2703_v32   ;;  %v1188_v4 = vmul.f32 %v1178_v52, %v1158_v19  ;;  %v1189_v1 = vmul.f32 %v1178_v52, %v1159_v40  ;;  %v2054_v32 = vld [vmem:[%s3010_s2 + $0x20] sm:$0xff] }
 0x16a   : > { %v1252_v40 = vsub.f32 %v2791_v5, %v1238_v60  ;;  %v1253_v28 = vsub.f32 %v2796_v2, %v1238_v60  ;;  %v1260_v23 = vmax.f32 %v1250_v29, 0.0  ;;  %v1261_v25 = vmax.f32 %v1251_v30, 0.0 }
 0x16b   : > { %v1194_v45 = vmul.f32 %v1184_v46, %v1184_v46  ;;  %v1195_v7 = vmul.f32 %v1185_v34, %v1185_v34  ;;  %v1198_v55 = vmul.f32 %v1188_v4, %v1188_v4  ;;  %v1199_v43 = vmul.f32 %v1189_v1, %v1189_v1 }
 0x16c   : > { %v1300_v6 = vsub.f32 %v2852_v12, %v2782_v56  ;;  %v1301_v59 = vsub.f32 %v2852_v12, %v2786_v47  ;;  %v1262_v4 = vmax.f32 %v1252_v40, 0.0  ;;  %v1263_v1 = vmax.f32 %v1253_v28, 0.0 }
 0x16d   : > { %v1201_v27 = vadd.f32 %v1200_v21, %v1194_v45  ;;  %v1211_v42 = vadd.f32 %v1210_v35, %v1195_v7  ;;  %v1257_v60 = vsub.f32 %v2831_v39, %v2842_v62 }
 0x16e   : > { %v1288_v17 = vpop.permute.xlu0 %1287  ;;  %v1311_v12 = vmax.f32 %v1301_v59, 0.0 }
 0x16f   : > { %v1202_v54 = vadd.f32 %v1201_v27, %v1196_v48  ;;  %v1212_v38 = vadd.f32 %v1211_v42, %v1197_v41  ;;  %v1302_v11 = vsub.f32 %v1288_v17, %v2791_v5  ;;  %v1303_v18 = vsub.f32 %v1288_v17, %v2796_v2 }
 0x170   : > { %1695 = vperm.xlu2 %2030, %v2754_v16   ;;  %v2859_v15 = vpop.permute.xlu2 %1295  ;;  %v1310_v48 = vmax.f32 %v1300_v6, 0.0  ;;  %v1270_v42 = vmin.f32 %v1260_v23, 1.0 }
 0x171   : > { %v1203_v0 = vadd.f32 %v1202_v54, %v1198_v55  ;;  %v1213_v57 = vadd.f32 %v1212_v38, %v1199_v43  ;;  %1651 = vperm.xlu1 %2029, %v2054_v32   ;;  %v1230_v13 = vpop.permute.xlu1 %1229  ;;  %v1312_v41 = vmax.f32 %v1302_v11, 0.0  ;;  %v1313_v27 = vmax.f32 %v1303_v18, 0.0 }
 0x172   : > { %v1248_v46 = vsub.f32 %v2759_v9, %v1230_v13  ;;  %v1249_v34 = vsub.f32 %v2763_v33, %v1230_v13  ;;  %v1271_v55 = vmin.f32 %v1261_v25, 1.0  ;;  %v1306_v30 = vsub.f32 %v2859_v15, %v2826_v37 }
 0x173   : > { %v1204_v51 = vrot.slane %v1203_v0, 4  ;;  %v1214_v14 = vrot.slane %v1213_v57, 4 }
 0x174   : > { %v1258_v43 = vmax.f32 %v1248_v46, 0.0  ;;  %v1259_v54 = vmax.f32 %v1249_v34, 0.0  ;;  %v1316_v18 = vmax.f32 %v1306_v30, 0.0 }
 0x175   : > { %v1205_v22 = vadd.f32 %v1204_v51, %v1203_v0  ;;  %v1215_v3 = vadd.f32 %v1214_v14, %v1213_v57  ;;  %v1272_v0 = vmin.f32 %v1262_v4, 1.0  ;;  %v1273_v57 = vmin.f32 %v1263_v1, 1.0 }
 0x176   : > { %v1340_v38 = vpop.permute.xlu0 %1339  ;;  %v1256_v14 = vsub.f32 %v2826_v37, %v2842_v62 }
 0x177   : > { %v1206_v36 = vrot.slane %v1205_v22, 2  ;;  %v1216_v10 = vrot.slane %v1215_v3, 2 }
 0x178   : > { %1707 = vperm.xlu2 %2030, %v2772_v53   ;;  %v2869_v53 = vpop.permute.xlu2 %1347  ;;  %v1266_v11 = vmax.f32 %v1256_v14, 0.0 }
 0x179   : > { %v1207_v16 = vadd.f32 %v1206_v36, %v1205_v22  ;;  %v1217_v61 = vadd.f32 %v1216_v10, %v1215_v3  ;;  %1703 = vperm.xlu1 %2029, %v2055_v50   ;;  %v1242_v58 = vpop.permute.xlu1 %1241  ;;  %v1320_v36 = vmin.f32 %v1310_v48, 1.0  ;;  %v1321_v10 = vmin.f32 %v1311_v12, 1.0 }
 0x17a   : > { %v1254_v32 = vsub.f32 %v2807_v24, %v1242_v58  ;;  %v1255_v13 = vsub.f32 %v2811_v8, %v1242_v58 }
 0x17b   : > { %v1208_v44 = vrot.slane %v1207_v16, 1  ;;  %v1218_v31 = vrot.slane %v1217_v61, 1  ;;  %v1330_v46 = vmul.f32 %v1320_v36, %v1270_v42  ;;  %v1331_v34 = vmul.f32 %v1321_v10, %v1271_v55 }
 0x17c   : > { %v1264_v62 = vmax.f32 %v1254_v32, 0.0  ;;  %v1265_v17 = vmax.f32 %v1255_v13, 0.0  ;;  %v1326_v42 = vmin.f32 %v1316_v18, 1.0 }
 0x17d   : > { %v1219_v20 = vadd.f32 %v1218_v31, %v1217_v61  ;;  %v1209_v63 = vadd.f32 %v1208_v44, %v1207_v16  ;;  %v1322_v16 = vmin.f32 %v1312_v41, 1.0  ;;  %v1323_v61 = vmin.f32 %v1313_v27, 1.0 }
 0x17e   : > { %v1268_v44 = vmin.f32 %v1258_v43, 1.0  ;;  %v1269_v31 = vmin.f32 %v1259_v54, 1.0  ;;  %v1352_v4 = vpop.permute.xlu0 %1351 }
 0x17f   : > { %v1222_v19 = vrot.slane %v1219_v20, 7  ;;  %v1307_v20 = vsub.f32 %v2859_v15, %v2831_v39  ;;  %v1332_v23 = vmul.f32 %v1322_v16, %v1272_v0  ;;  %v1333_v25 = vmul.f32 %v1323_v61, %v1273_v57 }
 0x180   : > { %v1276_v0 = vmin.f32 %v1266_v11, 1.0 }
 0x181   : > { %v1223_v26 = vsel %vm507_vm0, %v1209_v63, %v1222_v19  ;;  %v1280_v52 = vpop.permute.xlu1 %1279  ;;  %v2889_v51 = vpop.permute.xlu2 %1407 }
 0x182   : > { %1921 = vst.msk [vmem:[%s2534_s10 + $0x4] ss:$8 sm:$0x3] %vm2522_vm1, %v1223_v26  ;;  %v1298_v21 = vsub.f32 %v1280_v52, %v2759_v9  ;;  %v1299_v35 = vsub.f32 %v1280_v52, %v2763_v33  ;;  %v1267_v26 = vmax.f32 %v1257_v60, 0.0  ;;  %v1317_v52 = vmax.f32 %v1307_v20, 0.0 }
 0x184   : > { %v1308_v45 = vmax.f32 %v1298_v21, 0.0  ;;  %v1309_v7 = vmax.f32 %v1299_v35, 0.0  ;;  %v1274_v21 = vmin.f32 %v1264_v62, 1.0  ;;  %v1275_v35 = vmin.f32 %v1265_v17, 1.0 }
 0x185   : > { %v1277_v57 = vmin.f32 %v1267_v26, 1.0  ;;  %v1327_v55 = vmin.f32 %v1317_v52, 1.0 }
 0x186   : > { %v1318_v22 = vmin.f32 %v1308_v45, 1.0  ;;  %v1319_v3 = vmin.f32 %v1309_v7, 1.0  ;;  %v1362_v45 = vmul.f32 %v2869_v53, %v1332_v23  ;;  %v1363_v7 = vmul.f32 %v2869_v53, %v1333_v25  ;;  %v1412_v30 = vpop.permute.xlu0 %1411 }
 0x188   : > { %v1328_v63 = vmul.f32 %v1318_v22, %v1268_v44  ;;  %v1329_v19 = vmul.f32 %v1319_v3, %v1269_v31  ;;  %v1373_v22 = vmul.f32 %v1363_v7, %v1363_v7  ;;  %v1337_v44 = vmul.f32 %v1327_v55, %v1277_v57 }
 0x189   : > { %v1292_v50 = vpop.permute.xlu1 %1291  ;;  %v2903_v48 = vpop.permute.xlu2 %1419  ;;  %v1429_v7 = vsub.f32 %v2786_v47, %v1412_v30 }
 0x18a   : > { %v1304_v29 = vsub.f32 %v1292_v50, %v2807_v24  ;;  %v1305_v58 = vsub.f32 %v1292_v50, %v2811_v8  ;;  %v1358_v15 = vmul.f32 %v1340_v38, %v1328_v63  ;;  %v1359_v1 = vmul.f32 %v1340_v38, %v1329_v19 }
 0x18b   : > { %v1372_v38 = vmul.f32 %v1362_v45, %v1362_v45  ;;  %v1336_v50 = vmul.f32 %v1326_v42, %v1276_v0  ;;  %v1428_v45 = vsub.f32 %v2782_v56, %v1412_v30 }
 0x18c   : > { %v1314_v40 = vmax.f32 %v1304_v29, 0.0  ;;  %v1315_v28 = vmax.f32 %v1305_v58, 0.0  ;;  %v1368_v32 = vmul.f32 %v1358_v15, %v1358_v15  ;;  %v1369_v13 = vmul.f32 %v1359_v1, %v1359_v1 }
 0x18d   : > { %v1426_v15 = vsub.f32 %v2759_v9, %v2889_v51  ;;  %v1427_v1 = vsub.f32 %v2763_v33, %v2889_v51  ;;  %v1438_v55 = vmax.f32 %v1428_v45, 0.0 }
 0x18e   : > { %v1324_v6 = vmin.f32 %v1314_v40, 1.0  ;;  %v1325_v59 = vmin.f32 %v1315_v28, 1.0  ;;  %v1462_v52 = vpop.permute.xlu0 %1461 }
 0x18f   : > { %v1436_v57 = vmax.f32 %v1426_v15, 0.0  ;;  %v1437_v42 = vmax.f32 %v1427_v1, 0.0 }
 0x190   : > { %v1334_v41 = vmul.f32 %v1324_v6, %v1274_v21  ;;  %v1335_v27 = vmul.f32 %v1325_v59, %v1275_v35 }
 0x191   : > { %v1344_v12 = vpop.permute.xlu1 %1343  ;;  %v1458_v17 = vpop.permute.xlu2 %1457 }
 0x192   : > { %v1360_v43 = vmul.f32 %v1344_v12, %v1330_v46  ;;  %v1361_v54 = vmul.f32 %v1344_v12, %v1331_v34  ;;  %v1364_v3 = vmul.f32 %v1352_v4, %v1334_v41  ;;  %v1365_v36 = vmul.f32 %v1352_v4, %v1335_v27 }
 0x193   : > { %v1478_v27 = vsub.f32 %v1462_v52, %v2782_v56  ;;  %v1477_v51 = vsub.f32 %v1458_v17, %v2763_v33 }
 0x194   : > { %v1370_v14 = vmul.f32 %v1360_v43, %v1360_v43  ;;  %v1371_v60 = vmul.f32 %v1361_v54, %v1361_v54  ;;  %v1374_v29 = vmul.f32 %v1364_v3, %v1364_v3  ;;  %v1375_v58 = vmul.f32 %v1365_v36, %v1365_v36 }
 0x195   : > { %v1479_v43 = vsub.f32 %v1462_v52, %v2786_v47 }
 0x196   : > { %v1378_v53 = vadd.f32 %v1370_v14, %v1368_v32  ;;  %v1388_v10 = vadd.f32 %v1371_v60, %v1369_v13  ;;  %v1439_v32 = vmax.f32 %v1429_v7, 0.0  ;;  %v1476_v13 = vsub.f32 %v1458_v17, %v2759_v9  ;;  %v1474_v36 = vpop.permute.xlu0 %1473 }
 0x198   : > { %v1379_v16 = vadd.f32 %v1378_v53, %v1372_v38  ;;  %v1389_v61 = vadd.f32 %v1388_v10, %v1373_v22  ;;  %v1488_v38 = vmax.f32 %v1478_v27, 0.0  ;;  %v1489_v22 = vmax.f32 %v1479_v43, 0.0 }
 0x199   : > { %v1356_v31 = vpop.permute.xlu1 %1355  ;;  %v2905_v21 = vpop.permute.xlu2 %1469  ;;  %v1448_v53 = vmin.f32 %v1438_v55, 1.0  ;;  %v1449_v10 = vmin.f32 %v1439_v32, 1.0 }
 0x19a   : > { %v1366_v20 = vmul.f32 %v1356_v31, %v1336_v50  ;;  %v1367_v62 = vmul.f32 %v1356_v31, %v1337_v44  ;;  %v1380_v40 = vadd.f32 %v1379_v16, %v1374_v29  ;;  %v1390_v28 = vadd.f32 %v1389_v61, %v1375_v58 }
 0x19b   : > { %v1484_v16 = vsub.f32 %v1474_v36, %v2826_v37  ;;  %v1485_v61 = vsub.f32 %v1474_v36, %v2831_v39  ;;  %v1446_v44 = vmin.f32 %v1436_v57, 1.0  ;;  %v1447_v31 = vmin.f32 %v1437_v42, 1.0 }
 0x19c   : > { %v1376_v63 = vmul.f32 %v1366_v20, %v1366_v20  ;;  %v1377_v19 = vmul.f32 %v1367_v62, %v1367_v62  ;;  %v1486_v29 = vmax.f32 %v1476_v13, 0.0  ;;  %v1487_v58 = vmax.f32 %v1477_v51, 0.0 }
 0x19d   : > { %v1498_v30 = vmin.f32 %v1488_v38, 1.0  ;;  %v1499_v20 = vmin.f32 %v1489_v22, 1.0 }
 0x19e   : > { %v1381_v23 = vadd.f32 %v1380_v40, %v1376_v63  ;;  %v1391_v25 = vadd.f32 %v1390_v28, %v1377_v19  ;;  %v1432_v63 = vsub.f32 %v2807_v24, %v2903_v48  ;;  %v1433_v19 = vsub.f32 %v2811_v8, %v2903_v48  ;;  %v1526_v36 = vpop.permute.xlu0 %1525 }
 0x19f   : > { %v1497_v52 = vmin.f32 %v1487_v58, 1.0  ;;  %v1508_v15 = vmul.f32 %v1498_v30, %v1448_v53  ;;  %v1509_v1 = vmul.f32 %v1499_v20, %v1449_v10 }
 0x1a0   : > { %v1382_v11 = vrot.slane %v1381_v23, 4  ;;  %v1392_v26 = vrot.slane %v1391_v25, 4 }
 0x1a1   : > { %v1522_v50 = vpop.permute.xlu2 %1521  ;;  %v1507_v42 = vmul.f32 %v1497_v52, %v1447_v31 }
 0x1a2   : > { %v1383_v6 = vadd.f32 %v1382_v11, %v1381_v23  ;;  %v1393_v59 = vadd.f32 %v1392_v26, %v1391_v25  ;;  %v1416_v18 = vpop.permute.xlu1 %1415  ;;  %v1494_v25 = vmax.f32 %v1484_v16, 0.0  ;;  %v1495_v11 = vmax.f32 %v1485_v61, 0.0 }
 0x1a3   : > { %v1430_v62 = vsub.f32 %v2791_v5, %v1416_v18  ;;  %v1431_v17 = vsub.f32 %v2796_v2, %v1416_v18  ;;  %v1482_v18 = vsub.f32 %v2905_v21, %v2807_v24 }
 0x1a4   : > { %v1384_v46 = vrot.slane %v1383_v6, 2  ;;  %v1394_v34 = vrot.slane %v1393_v59, 2 }
 0x1a5   : > { %v1440_v48 = vmax.f32 %v1430_v62, 0.0  ;;  %v1492_v55 = vmax.f32 %v1482_v18, 0.0 }
 0x1a6   : > { %v1385_v35 = vadd.f32 %v1384_v46, %v1383_v6  ;;  %v1395_v4 = vadd.f32 %v1394_v34, %v1393_v59  ;;  %v1496_v59 = vmin.f32 %v1486_v29, 1.0  ;;  %v1483_v46 = vsub.f32 %v2905_v21, %v2811_v8 }
 0x1a7   : > { %v1441_v34 = vmax.f32 %v1431_v17, 0.0  ;;  %v1450_v13 = vmin.f32 %v1440_v48, 1.0  ;;  %v1502_v30 = vmin.f32 %v1492_v55, 1.0 }
 0x1a8   : > { %v1386_v12 = vrot.slane %v1385_v35, 1  ;;  %v1396_v41 = vrot.slane %v1395_v4, 1  ;;  %v1506_v57 = vmul.f32 %v1496_v59, %v1446_v44  ;;  %v1493_v32 = vmax.f32 %v1483_v46, 0.0 }
 0x1a9   : > { %v1451_v21 = vmin.f32 %v1441_v34, 1.0  ;;  %v1534_v51 = vpop.permute.xlu2 %1533 }
 0x1aa   : > { %v1397_v54 = vadd.f32 %v1396_v41, %v1395_v4  ;;  %v1424_v0 = vpop.permute.xlu1 %1423  ;;  %v1387_v14 = vadd.f32 %v1386_v12, %v1385_v35  ;;  %v1442_v12 = vmax.f32 %v1432_v63, 0.0  ;;  %v1443_v41 = vmax.f32 %v1433_v19, 0.0 }
 0x1ab   : > { %v1434_v40 = vsub.f32 %v2826_v37, %v1424_v0  ;;  %v1435_v28 = vsub.f32 %v2831_v39, %v1424_v0  ;;  %v1505_v0 = vmin.f32 %v1495_v11, 1.0  ;;  %v1503_v44 = vmin.f32 %v1493_v32, 1.0 }
 0x1ac   : > { %v1400_v60 = vrot.slane %v1397_v54, 7  ;;  %v1504_v54 = vmin.f32 %v1494_v25, 1.0  ;;  %v1452_v29 = vmin.f32 %v1442_v12, 1.0  ;;  %v1453_v58 = vmin.f32 %v1443_v41, 1.0 }
 0x1ad   : > { %v1444_v45 = vmax.f32 %v1434_v40, 0.0  ;;  %v1445_v7 = vmax.f32 %v1435_v28, 0.0 }
 0x1ae   : > { %v1401_v3 = vsel %vm507_vm0, %v1387_v14, %v1400_v60  ;;  %v1538_v14 = vmul.f32 %v1522_v50, %v1508_v15  ;;  %v1539_v60 = vmul.f32 %v1522_v50, %v1509_v1  ;;  %v1512_v25 = vmul.f32 %v1502_v30, %v1452_v29 }
 0x1af   : > { %1922 = vst.msk [vmem:[%s2534_s10 + $0x5] ss:$8 sm:$0x3] %vm2522_vm1, %v1401_v3  ;;  %v1454_v38 = vmin.f32 %v1444_v45, 1.0  ;;  %v1455_v22 = vmin.f32 %v1445_v7, 1.0  ;;  %v1513_v11 = vmul.f32 %v1503_v44, %v1453_v58 }
 0x1b0   : > { %v1548_v63 = vmul.f32 %v1538_v14, %v1538_v14  ;;  %v1549_v19 = vmul.f32 %v1539_v60, %v1539_v60 }
 0x1b1   : > { %v1514_v62 = vmul.f32 %v1504_v54, %v1454_v38  ;;  %v1515_v17 = vmul.f32 %v1505_v0, %v1455_v22 }
 0x1b2   : > { %v1466_v23 = vpop.permute.xlu1 %1465  ;;  %v2937_v46 = vpop.permute.xlu2 %1593 }
 0x1b3   : > { %v1480_v26 = vsub.f32 %v1466_v23, %v2791_v5  ;;  %v1481_v6 = vsub.f32 %v1466_v23, %v2796_v2 }
 0x1b5   : > { %v1490_v35 = vmax.f32 %v1480_v26, 0.0  ;;  %v1491_v4 = vmax.f32 %v1481_v6, 0.0  ;;  %v1544_v26 = vmul.f32 %v1534_v51, %v1514_v62  ;;  %v1545_v6 = vmul.f32 %v1534_v51, %v1515_v17 }
 0x1b7   : > { %v1500_v27 = vmin.f32 %v1490_v35, 1.0  ;;  %v1501_v43 = vmin.f32 %v1491_v4, 1.0  ;;  %v1586_v35 = vpop.permute.xlu0 %1585  ;;  %v1554_v7 = vmul.f32 %v1544_v26, %v1544_v26  ;;  %v1555_v12 = vmul.f32 %v1545_v6, %v1545_v6 }
 0x1b8   : > { %v1604_v22 = vsub.f32 %v2759_v9, %v1586_v35 }
 0x1b9   : > { %v1510_v53 = vmul.f32 %v1500_v27, %v1450_v13  ;;  %v1511_v10 = vmul.f32 %v1501_v43, %v1451_v21 }
 0x1ba   : > { %v1518_v3 = vpop.permute.xlu1 %1517  ;;  %v1640_v55 = vpop.permute.xlu2 %1639  ;;  %v1614_v58 = vmax.f32 %v1604_v22, 0.0 }
 0x1bb   : > { %v1536_v16 = vmul.f32 %v1518_v3, %v1506_v57  ;;  %v1537_v61 = vmul.f32 %v1518_v3, %v1507_v42  ;;  %v1540_v40 = vmul.f32 %v1526_v36, %v1510_v53  ;;  %v1541_v50 = vmul.f32 %v1526_v36, %v1511_v10 }
 0x1bc   : > { %v1605_v3 = vsub.f32 %v2763_v33, %v1586_v35  ;;  %v1656_v44 = vsub.f32 %v1640_v55, %v2782_v56  ;;  %v1608_v35 = vsub.f32 %v2791_v5, %v2937_v46 }
 0x1bd   : > { %v1546_v31 = vmul.f32 %v1536_v16, %v1536_v16  ;;  %v1547_v20 = vmul.f32 %v1537_v61, %v1537_v61  ;;  %v1550_v52 = vmul.f32 %v1540_v40, %v1540_v40  ;;  %v1551_v18 = vmul.f32 %v1541_v50, %v1541_v50 }
 0x1be   : > { %v1615_v30 = vmax.f32 %v1605_v3, 0.0  ;;  %v1666_v26 = vmax.f32 %v1656_v44, 0.0 }
 0x1bf   : > { %v1556_v28 = vadd.f32 %v1548_v63, %v1546_v31  ;;  %v1566_v23 = vadd.f32 %v1549_v19, %v1547_v20  ;;  %v1644_v21 = vpop.permute.xlu0 %1643  ;;  %v1657_v31 = vsub.f32 %v1640_v55, %v2786_v47 }
 0x1c0   : > { %v1658_v40 = vsub.f32 %v1644_v21, %v2791_v5  ;;  %v1618_v5 = vmax.f32 %v1608_v35, 0.0 }
 0x1c1   : > { %v1557_v1 = vadd.f32 %v1556_v28, %v1550_v52  ;;  %v1567_v45 = vadd.f32 %v1566_v23, %v1551_v18  ;;  %v1667_v6 = vmax.f32 %v1657_v31, 0.0 }
 0x1c2   : > { %v1530_v59 = vpop.permute.xlu1 %1529  ;;  %v1648_v17 = vpop.permute.xlu2 %1647 }
 0x1c3   : > { %v1542_v48 = vmul.f32 %v1530_v59, %v1512_v25  ;;  %v1543_v34 = vmul.f32 %v1530_v59, %v1513_v11  ;;  %v1624_v25 = vmin.f32 %v1614_v58, 1.0  ;;  %v1625_v11 = vmin.f32 %v1615_v30, 1.0 }
 0x1c5   : > { %v1552_v4 = vmul.f32 %v1542_v48, %v1542_v48  ;;  %v1553_v15 = vmul.f32 %v1543_v34, %v1543_v34 }
 0x1c7   : > { %v1558_v41 = vadd.f32 %v1557_v1, %v1552_v4  ;;  %v1568_v27 = vadd.f32 %v1567_v45, %v1553_v15  ;;  %v1602_v50 = vpop.permute.xlu0 %1601  ;;  %v1609_v4 = vsub.f32 %v2796_v2, %v2937_v46 }
 0x1c8   : > { %v1612_v45 = vsub.f32 %v2826_v37, %v1602_v50 }
 0x1c9   : > { %v1559_v43 = vadd.f32 %v1558_v41, %v1554_v7  ;;  %v1569_v54 = vadd.f32 %v1568_v27, %v1555_v12  ;;  %v1613_v7 = vsub.f32 %v2831_v39, %v1602_v50  ;;  %v1660_v12 = vsub.f32 %v1648_v17, %v2807_v24 }
 0x1ca   : > { %v1661_v41 = vsub.f32 %v1648_v17, %v2811_v8  ;;  %v1676_v27 = vmin.f32 %v1666_v26, 1.0  ;;  %v1619_v55 = vmax.f32 %v1609_v4, 0.0 }
 0x1cb   : > { %v1560_v0 = vrot.slane %v1559_v43, 4  ;;  %v1570_v57 = vrot.slane %v1569_v54, 4  ;;  %v1590_v42 = vpop.permute.xlu1 %1589 }
 0x1cc   : > { %v1606_v63 = vsub.f32 %v2782_v56, %v1590_v42  ;;  %v1607_v19 = vsub.f32 %v2786_v47, %v1590_v42  ;;  %v1668_v47 = vmax.f32 %v1658_v40, 0.0 }
 0x1cd   : > { %v1561_v32 = vadd.f32 %v1560_v0, %v1559_v43  ;;  %v1571_v13 = vadd.f32 %v1570_v57, %v1569_v54  ;;  %v1677_v43 = vmin.f32 %v1667_v6, 1.0 }
 0x1ce   : > { %v1616_v59 = vmax.f32 %v1606_v63, 0.0  ;;  %v1617_v56 = vmax.f32 %v1607_v19, 0.0 }
 0x1cf   : > { %v1562_v51 = vrot.slane %v1561_v32, 2  ;;  %v1572_v14 = vrot.slane %v1571_v13, 2 }
 0x1d0   : > { %v1626_v54 = vmin.f32 %v1616_v59, 1.0  ;;  %v1627_v0 = vmin.f32 %v1617_v56, 1.0 }
 0x1d1   : > { %v1563_v60 = vadd.f32 %v1562_v51, %v1561_v32  ;;  %v1573_v38 = vadd.f32 %v1572_v14, %v1571_v13  ;;  %v1696_v32 = vpop.permute.xlu2 %1695  ;;  %v1678_v13 = vmin.f32 %v1668_v47, 1.0  ;;  %v1670_v51 = vmax.f32 %v1660_v12, 0.0 }
 0x1d2   : > { %v1671_v14 = vmax.f32 %v1661_v41, 0.0  ;;  %v1686_v22 = vmul.f32 %v1676_v27, %v1626_v54 }
 0x1d3   : > { %v1564_v36 = vrot.slane %v1563_v60, 1  ;;  %v1574_v53 = vrot.slane %v1573_v38, 1  ;;  %v1636_v10 = vpop.permute.xlu1 %1635  ;;  %v1680_v44 = vmin.f32 %v1670_v51, 1.0 }
 0x1d4   : > { %v1654_v61 = vsub.f32 %v1636_v10, %v2759_v9  ;;  %v1655_v29 = vsub.f32 %v1636_v10, %v2763_v33  ;;  %v1659_v9 = vsub.f32 %v1644_v21, %v2796_v2  ;;  %v1681_v31 = vmin.f32 %v1671_v14, 1.0 }
 0x1d5   : > { %v1575_v16 = vadd.f32 %v1574_v53, %v1573_v38  ;;  %v1565_v20 = vadd.f32 %v1564_v36, %v1563_v60  ;;  %v1622_v60 = vmax.f32 %v1612_v45, 0.0  ;;  %v1623_v38 = vmax.f32 %v1613_v7, 0.0 }
 0x1d6   : > { %v1664_v28 = vmax.f32 %v1654_v61, 0.0  ;;  %v1665_v23 = vmax.f32 %v1655_v29, 0.0  ;;  %v1669_v18 = vmax.f32 %v1659_v9, 0.0  ;;  %v1628_v61 = vmin.f32 %v1618_v5, 1.0 }
 0x1d7   : > { %v1578_v62 = vrot.slane %v1575_v16, 7  ;;  %v1629_v29 = vmin.f32 %v1619_v55, 1.0  ;;  %v1632_v17 = vmin.f32 %v1622_v60, 1.0  ;;  %v1633_v63 = vmin.f32 %v1623_v38, 1.0 }
 0x1d8   : > { %v1674_v15 = vmin.f32 %v1664_v28, 1.0  ;;  %v1675_v1 = vmin.f32 %v1665_v23, 1.0  ;;  %v1679_v21 = vmin.f32 %v1669_v18, 1.0 }
 0x1d9   : > { %v1579_v33 = vsel %vm507_vm0, %v1565_v20, %v1578_v62  ;;  %v1708_v6 = vpop.permute.xlu2 %1707 }
 0x1da   : > { %1923 = vst.msk [vmem:[%s2534_s10 + $0x6] ss:$8 sm:$0x3] %vm2522_vm1, %v1579_v33  ;;  %v1684_v2 = vmul.f32 %v1674_v15, %v1624_v25  ;;  %v1685_v46 = vmul.f32 %v1675_v1, %v1625_v11  ;;  %v1688_v11 = vmul.f32 %v1678_v13, %v1628_v61  ;;  %v1689_v26 = vmul.f32 %v1679_v21, %v1629_v29 }
 0x1db   : > { %v1598_v52 = vpop.permute.xlu1 %1597 }
 0x1dc   : > { %v1610_v48 = vsub.f32 %v2807_v24, %v1598_v52  ;;  %v1611_v34 = vsub.f32 %v2811_v8, %v1598_v52  ;;  %v1700_v24 = vpop.permute.xlu0 %1699  ;;  %v1687_v8 = vmul.f32 %v1677_v43, %v1627_v0  ;;  %v1714_v58 = vmul.f32 %v1696_v32, %v1684_v2 }
 0x1dd   : > { %v1715_v30 = vmul.f32 %v1696_v32, %v1685_v46  ;;  %v1716_v19 = vmul.f32 %v1700_v24, %v1686_v22 }
 0x1de   : > { %v1620_v57 = vmax.f32 %v1610_v48, 0.0  ;;  %v1621_v42 = vmax.f32 %v1611_v34, 0.0  ;;  %v1717_v40 = vmul.f32 %v1700_v24, %v1687_v8  ;;  %v1724_v23 = vmul.f32 %v1714_v58, %v1714_v58 }
 0x1df   : > { %v1726_v56 = vmul.f32 %v1716_v19, %v1716_v19 }
 0x1e0   : > { %v1630_v36 = vmin.f32 %v1620_v57, 1.0  ;;  %v1631_v53 = vmin.f32 %v1621_v42, 1.0  ;;  %v1727_v52 = vmul.f32 %v1717_v40, %v1717_v40 }
 0x1e1   : > { %v1734_v4 = vadd.f32 %v1726_v56, %v1724_v23 }
 0x1e2   : > { %v1690_v9 = vmul.f32 %v1680_v44, %v1630_v36  ;;  %v1691_v50 = vmul.f32 %v1681_v31, %v1631_v53 }
 0x1e3   : > { %v1652_v3 = vpop.permute.xlu1 %1651 }
 0x1e4   : > { %v1662_v10 = vsub.f32 %v1652_v3, %v2826_v37  ;;  %v1663_v16 = vsub.f32 %v1652_v3, %v2831_v39  ;;  %v1725_v37 = vmul.f32 %v1715_v30, %v1715_v30  ;;  %v1720_v47 = vmul.f32 %v1708_v6, %v1690_v9  ;;  %v1712_v35 = vpop.permute.xlu0 %1711 }
 0x1e5   : > { %v1721_v18 = vmul.f32 %v1708_v6, %v1691_v50 }
 0x1e6   : > { %v1672_v20 = vmax.f32 %v1662_v10, 0.0  ;;  %v1673_v62 = vmax.f32 %v1663_v16, 0.0  ;;  %v1744_v15 = vadd.f32 %v1727_v52, %v1725_v37  ;;  %v1730_v41 = vmul.f32 %v1720_v47, %v1720_v47 }
 0x1e7   : > { %v1731_v27 = vmul.f32 %v1721_v18, %v1721_v18 }
 0x1e8   : > { %v1682_v33 = vmin.f32 %v1672_v20, 1.0  ;;  %v1683_v28 = vmin.f32 %v1673_v62, 1.0 }
 0x1ea   : > { %v1692_v25 = vmul.f32 %v1682_v33, %v1632_v17  ;;  %v1693_v39 = vmul.f32 %v1683_v28, %v1633_v63 }
 0x1eb   : > { %v1704_v59 = vpop.permute.xlu1 %1703 }
 0x1ec   : > { %v1718_v48 = vmul.f32 %v1704_v59, %v1688_v11  ;;  %v1719_v34 = vmul.f32 %v1704_v59, %v1689_v26  ;;  %v1722_v1 = vmul.f32 %v1712_v35, %v1692_v25  ;;  %v1723_v45 = vmul.f32 %v1712_v35, %v1693_v39 }
 0x1ee   : > { %v1728_v7 = vmul.f32 %v1718_v48, %v1718_v48  ;;  %v1729_v12 = vmul.f32 %v1719_v34, %v1719_v34  ;;  %v1732_v0 = vmul.f32 %v1722_v1, %v1722_v1  ;;  %v1733_v57 = vmul.f32 %v1723_v45, %v1723_v45 }
 0x1f0   : > { %v1735_v43 = vadd.f32 %v1734_v4, %v1728_v7  ;;  %v1745_v54 = vadd.f32 %v1744_v15, %v1729_v12 }
 0x1f2   : > { %v1736_v42 = vadd.f32 %v1735_v43, %v1730_v41  ;;  %v1746_v5 = vadd.f32 %v1745_v54, %v1731_v27 }
 0x1f4   : > { %v1737_v55 = vadd.f32 %v1736_v42, %v1732_v0  ;;  %v1747_v32 = vadd.f32 %v1746_v5, %v1733_v57 }
 0x1f6   : > { %v1738_v2 = vrot.slane %v1737_v55, 4  ;;  %v1748_v46 = vrot.slane %v1747_v32, 4 }
 0x1f8   : > { %v1739_v13 = vadd.f32 %v1738_v2, %v1737_v55  ;;  %v1749_v21 = vadd.f32 %v1748_v46, %v1747_v32 }
 0x1fa   : > { %v1740_v51 = vrot.slane %v1739_v13, 2  ;;  %v1750_v14 = vrot.slane %v1749_v21, 2 }
 0x1fc   : > { %v1741_v60 = vadd.f32 %v1740_v51, %v1739_v13  ;;  %v1751_v38 = vadd.f32 %v1750_v14, %v1749_v21 }
 0x1fe   : > { %v1742_v24 = vrot.slane %v1741_v60, 1  ;;  %v1752_v22 = vrot.slane %v1751_v38, 1 }
 0x200   : > { %v1753_v8 = vadd.f32 %v1752_v22, %v1751_v38  ;;  %v1743_v3 = vadd.f32 %v1742_v24, %v1741_v60 }
 0x202   : > { %v1756_v36 = vrot.slane %v1753_v8, 7 }
 0x204   : > { %v1757_v53 = vsel %vm507_vm0, %v1743_v3, %v1756_v36 }
 0x205   : > { %1924 = vst.msk [vmem:[%s2534_s10 + $0x7] ss:$8 sm:$0x3] %vm2522_vm1, %v1757_v53 }
 0x206   : > { %2113 = shalt.err (!%p2110_p13)
}
 0x207   : > { %1936 = dma.vmem_to_hbm [thread:$0]  (%p2257_p9), %s1779_s24, 256, %s1781_s26, %s1763_s18  }
 0x208 PF: > { %s1792_s25 = sand.u32 1, %s2148_s15   ;;  %p1943_p0 = pnand %p1913_p12, %p2264_p11 }
 0x209   : > { %s1793_s10 = scalar_lea.sflag [#allocation4], %s1792_s25 }
 0x20a   : > { %p1944_p1 = pneg %p1943_p0 }
 0x20c   : > { %2143 = dma.done.wait (%p1944_p1), %s1793_s10, 256  }
 0x20d   : > { %2145 = vsyncadd (%p1944_p1), %s1793_s10, 4294967040  ;;  %s20_s20 = sadd.s32 1, %s2168_s20   ;;  %s3027_s15 = smov %s2152_s16 }
 0x20e   : > { %p17_p2 = scmp.ge.s32.totalorder %s20_s20, 4   ;;  %s3028_s16 = smov %s2156_s17 }
 0x20f   : > { %s3029_s17 = smov %s2262_s29  ;;  %s3030_s18 = smov %s2164_s19 }
 0x210   : > { %s3031_s19 = smov %s3033_s23  ;;  %19 = sbr.rel (!%p17_p2) target bundleno = 6 (0x6), region = 97 }
 0x215   :  { %1799 = vsyncpa [#allocation3], 1 }
 0x216   :  { %1801 = vsyncpa [#allocation3 + $0x1], 1 }
 0x217   :  { %1802 = vsyncpa [#allocation4], 1 }
 0x218   :  { %1804 = vsyncpa [#allocation4 + $0x1], 1 }

</bundles_post_ra>
